<compile_context>
chip_gen: v6e
topology: v6e:2x2x1
jax: 0.10.0
libtpu: 0.0.40
codegen_flags: <defaults>
</compile_context>

<pallas_src>
import jax
import jax.numpy as jnp
from jax.experimental import pallas as pl
from jax.experimental.pallas import tpu as pltpu


NOUTPUTS = 10
NFEATS = 4
NSTATES = [8, 16, 32, 64]
KERNELS = [3, 2]
STRIDES = [1, 1]
POOLSIZE = 2

HIN = WIN = 24                      # input spatial size -> final pooled map is 2x2
HP = HIN + 2                        # conv1 padding=1 -> padded base grid 26x26
WP = WIN + 2
IMG = HP * WP                       # 676 base-grid pixels per image
SLOT = ((IMG + 127) // 128) * 128   # per-image lane width (768), 128-aligned
LANE = 128                          # classifier / output lane width


def _layout_checks():
    """Static guards for the lane-flat layout (fail loudly if hparams change)."""
    # Final pooled map must be kernels[1] x kernels[1] (the module's flatten constraint).
    s1 = HIN                            # conv1 out (pad=1, k=3, s=1)
    p1 = s1 // POOLSIZE
    s2 = p1 - KERNELS[1] + 1
    p2 = s2 // POOLSIZE
    s3 = p2 - KERNELS[1] + 1
    p3 = s3 // POOLSIZE
    assert p3 == KERNELS[1], p3
    assert NSTATES[2] * KERNELS[1] ** 2 == LANE, "fc_in must be 128 for the 1-tile classifier"

    # pltpu.roll is circular over the SLOT lanes of one image.  For every stage,
    # the largest lane it reads (while producing a lane that is later consumed)
    # must stay below the region where the *previous* stage's roll wrapped
    # garbage in.  (out_size, out_base_stride, tap_count, tap_base_stride).
    stages = [
        (s1, 1, KERNELS[0], 1),                       # conv1
        (p1, POOLSIZE, POOLSIZE, 1),                  # pool1
        (s2, POOLSIZE, KERNELS[1], POOLSIZE),         # conv2
        (p2, POOLSIZE ** 2, POOLSIZE, POOLSIZE),      # pool2
        (s3, POOLSIZE ** 2, KERNELS[1], POOLSIZE ** 2),  # conv3
        (p3, POOLSIZE ** 3, POOLSIZE, POOLSIZE ** 2),    # pool3
    ]
    prev_wrap = SLOT                                  # raw input has no wrapped garbage
    for out_size, out_stride, k, tap_stride in stages:
        off = tap_stride * (k - 1) * (WP + 1)
        max_read = (out_size - 1) * out_stride * (WP + 1) + off
        assert max_read < prev_wrap, (max_read, prev_wrap)
        prev_wrap = SLOT - off
    # classifier reads a 128-lane window starting at each final 2x2 position
    cls_read = (POOLSIZE ** 3) * (WP + 1) + LANE - 1
    assert cls_read < prev_wrap, (cls_read, prev_wrap)


_layout_checks()


# ----------------------------------------------------------------------------
# Fused Pallas kernel: whole network for ONE image per grid step, VMEM-resident.
# ----------------------------------------------------------------------------
def _dlc_kernel(x_ref, w1_ref, b1_ref, w2_ref, b2_ref, w3_ref, b3_ref,
                w1f_ref, b1f_ref, w2f_ref, b2f_ref, o_ref):
    """Activations are (channels, SLOT) f32 values: channels on sublanes, the
    flattened padded 26x26 base grid on lanes.  A conv/pool at base-grid stride
    s reads lane offset s*(di*WP+dj) via pltpu.roll.  Each conv is ONE MXU
    matmul over the tap-stacked (k*k*C, SLOT) activation; MXU operands are
    bf16, accumulation and all elementwise work stay f32."""

    def shift(v, off):
        # result[:, m] = v[:, (m + off) mod SLOT]
        return v if off == 0 else pltpu.roll(v, SLOT - off, axis=1)

    def conv_bn_relu(act, w_ref, b_ref, ksize, stride):
        taps = [shift(act, stride * (di * WP + dj))
                for di in range(ksize) for dj in range(ksize)]
        stacked = jnp.concatenate(taps, axis=0).astype(jnp.bfloat16)   # (k*k*C, SLOT)
        y = jnp.dot(w_ref[...], stacked, preferred_element_type=jnp.float32)
        return jnp.maximum(y + b_ref[...], 0.0)          # BN folded into w/b

    def maxpool(act, stride):
        out = act
        for pi in range(POOLSIZE):
            for pj in range(POOLSIZE):
                if pi or pj:
                    out = jnp.maximum(out, shift(act, stride * (pi * WP + pj)))
        return out

    a = x_ref[...]                                       # (nfeats, SLOT) f32
    a = conv_bn_relu(a, w1_ref, b1_ref, KERNELS[0], 1)
    a = maxpool(a, 1)                                    # valid data now at stride 2
    a = conv_bn_relu(a, w2_ref, b2_ref, KERNELS[1], 2)
    a = maxpool(a, 2)                                    # stride 4
    a = conv_bn_relu(a, w3_ref, b3_ref, KERNELS[1], 4)
    a = maxpool(a, 4)                                    # stride 8 -> valid 2x2 map
    # TODO(synk): once the per-step batch tile grows, compact the feature map
    # after pool1 (12x12 valid lanes -> a 256-lane slot) to cut layer-2/3
    # roll/max/matmul lane width ~3-6x.

    # Classifier: roll each of the 4 final-map positions to lane 0 and stack
    # them on sublanes -> (128, 128) operand; fc1 is a single matmul (no dense
    # one-hot gather, no O(B^2) input).  Only lane 0 of the result is valid.
    npos = KERNELS[1] * KERNELS[1]
    stride_f = POOLSIZE ** 3
    feats = []
    for pos in range(npos):
        off = stride_f * ((pos // KERNELS[1]) * WP + pos % KERNELS[1])   # 0, 8, 208, 216
        feats.append(shift(a, off)[:, :LANE])
    feat = jnp.concatenate(feats, axis=0).astype(jnp.bfloat16)           # (128, 128)

    z1 = jnp.dot(w1f_ref[...], feat, preferred_element_type=jnp.float32)
    z1 = jnp.maximum(z1 + b1f_ref[...], 0.0)                             # (64, 128)
    z2 = jnp.dot(w2f_ref[...], z1.astype(jnp.bfloat16),
                 preferred_element_type=jnp.float32) + b2f_ref[...]      # (10, 128)
    o_ref[...] = z2                                      # lane 0 = this image's logits


# ----------------------------------------------------------------------------
# Wrapper: parameter folding / packing (tiny, plain JAX) + single pallas_call.
# ----------------------------------------------------------------------------
def _fold_bn(w, conv_b, gamma, beta, mean, var, eps=1e-5):
    scale = gamma / jnp.sqrt(var + eps)
    w_f = w * scale[:, None, None, None]
    b_f = (conv_b - mean) * scale + beta
    return w_f, b_f


def _pack_conv_w(w):
    """(O, C, kh, kw) -> (O, kh*kw*C); column = (di*kw+dj)*C + c to match the
    tap-stacked activation rows."""
    o, c, kh, kw = w.shape
    return w.transpose(0, 2, 3, 1).reshape(o, kh * kw * c)


def dlc_forward(x, p):
    B, C, H, W = x.shape
    assert (C, H, W) == (NFEATS, HIN, WIN)

    # Input repack: pad (conv1 padding=1) and lane-flatten to (B, C, SLOT).
    # TODO(synk): keep activations in this lane-flat layout across calls (or DMA
    # raw rows from an ANY-space ref into a zeroed VMEM scratch) to avoid this
    # extra XLA pad/reshape pass over the input in HBM at large batch.
    xp = jnp.pad(x, ((0, 0), (0, 0), (1, 1), (1, 1))).reshape(B, C, IMG)
    x_pack = jnp.pad(xp, ((0, 0), (0, 0), (0, SLOT - IMG)))             # (B, C, SLOT)

    w1, c1 = _fold_bn(p["w1"], p["b1"], p["g1"], p["be1"], p["m1"], p["v1"])
    w2, c2 = _fold_bn(p["w2"], p["b2"], p["g2"], p["be2"], p["m2"], p["v2"])
    w3, c3 = _fold_bn(p["w3"], p["b3"], p["g3"], p["be3"], p["m3"], p["v3"])
    w1r = _pack_conv_w(w1).astype(jnp.bfloat16)                         # (8, 36)
    w2r = _pack_conv_w(w2).astype(jnp.bfloat16)                         # (16, 32)
    w3r = _pack_conv_w(w3).astype(jnp.bfloat16)                         # (32, 64)
    c1, c2, c3 = c1.reshape(-1, 1), c2.reshape(-1, 1), c3.reshape(-1, 1)

    npos = KERNELS[1] * KERNELS[1]
    # PyTorch flatten orders fc1 columns as c*npos + pos; reorder to pos*32 + c
    # to match the sublane-stacked classifier operand.
    w1f = (p["fc1_w"].reshape(NSTATES[3], NSTATES[2], npos)
           .transpose(0, 2, 1).reshape(NSTATES[3], NSTATES[2] * npos)
           .astype(jnp.bfloat16))                                        # (64, 128)
    b1f = p["fc1_b"].reshape(-1, 1)
    w2f = p["fc2_w"].astype(jnp.bfloat16)                                # (10, 64)
    b2f = p["fc2_b"].reshape(-1, 1)

    inputs = [x_pack, w1r, c1, w2r, c2, w3r, c3, w1f, b1f, w2f, b2f]

    def resident(a):   # full-array block, constant index_map -> stays VMEM-resident
        return pl.BlockSpec(a.shape, lambda i, n=a.ndim: (0,) * n)

    out = pl.pallas_call(
        _dlc_kernel,
        out_shape=jax.ShapeDtypeStruct((NOUTPUTS, B * LANE), jnp.float32),
        grid=(B,),                                      # one image per grid step
        in_specs=[pl.BlockSpec((None, NFEATS, SLOT), lambda i: (i, 0, 0))]
                 + [resident(a) for a in inputs[1:]],
        out_specs=pl.BlockSpec((NOUTPUTS, LANE), lambda i: (0, i)),
        compiler_params=pltpu.CompilerParams(
            dimension_semantics=("parallel",)),         # megacore-shardable batch axis
    )(*inputs)

    # Lane 0 of each image's 128-lane output tile holds its logits.
    return out.reshape(NOUTPUTS, B, LANE)[:, :, 0].T                     # (B, noutputs)


# ----------------------------------------------------------------------------
# Pure-JAX reference (matches the PyTorch module in inference mode), f32.
# ----------------------------------------------------------------------------
def dlc_reference(x, p):
    def conv_bn_relu(a, w, b, g, be, m, v, stride, pad, eps=1e-5):
        y = jax.lax.conv_general_dilated(
            a, w, window_strides=(stride, stride),
            padding=((pad, pad), (pad, pad)),
            dimension_numbers=("NCHW", "OIHW", "NCHW"))
        y = y + b[None, :, None, None]
        scale = g / jnp.sqrt(v + eps)
        y = (y - m[None, :, None, None]) * scale[None, :, None, None] + be[None, :, None, None]
        return jnp.maximum(y, 0.0)

    def maxpool(a, k):
        return jax.lax.reduce_window(a, -jnp.inf, jax.lax.max,
                                     (1, 1, k, k), (1, 1, k, k), "VALID")

    a = conv_bn_relu(x, p["w1"], p["b1"], p["g1"], p["be1"], p["m1"], p["v1"], STRIDES[0], 1)
    a = maxpool(a, POOLSIZE)
    a = conv_bn_relu(a, p["w2"], p["b2"], p["g2"], p["be2"], p["m2"], p["v2"], STRIDES[1], 0)
    a = maxpool(a, POOLSIZE)
    a = conv_bn_relu(a, p["w3"], p["b3"], p["g3"], p["be3"], p["m3"], p["v3"], STRIDES[1], 0)
    a = maxpool(a, POOLSIZE)
    a = a.reshape(x.shape[0], NSTATES[2] * KERNELS[1] * KERNELS[1])
    a = jnp.maximum(a @ p["fc1_w"].T + p["fc1_b"], 0.0)
    return a @ p["fc2_w"].T + p["fc2_b"]


# ----------------------------------------------------------------------------
# Parameter init (Conv/BN/Linear, inference-mode BN stats).
# ----------------------------------------------------------------------------
def init_params(key):
    ks = jax.random.split(key, 16)
    p = {}

    def conv_block(i, k_, cin, cout):
        fan_in = cin * k_ * k_
        p[f"w{i}"] = jax.random.normal(ks[4 * (i - 1) + 0], (cout, cin, k_, k_),
                                       jnp.float32) / jnp.sqrt(fan_in)
        p[f"b{i}"] = jax.random.normal(ks[4 * (i - 1) + 1], (cout,), jnp.float32) * 0.1
        p[f"g{i}"] = 1.0 + 0.1 * jax.random.normal(ks[4 * (i - 1) + 2], (cout,), jnp.float32)
        p[f"be{i}"] = 0.1 * jax.random.normal(ks[4 * (i - 1) + 3], (cout,), jnp.float32)
        p[f"m{i}"] = jnp.zeros((cout,), jnp.float32) + 0.05 * i
        p[f"v{i}"] = jnp.ones((cout,), jnp.float32) * (1.0 + 0.1 * i)

    conv_block(1, KERNELS[0], NFEATS, NSTATES[0])
    conv_block(2, KERNELS[1], NSTATES[0], NSTATES[1])
    conv_block(3, KERNELS[1], NSTATES[1], NSTATES[2])

    fc_in = NSTATES[2] * KERNELS[1] * KERNELS[1]
    p["fc1_w"] = jax.random.normal(ks[12], (NSTATES[3], fc_in), jnp.float32) / jnp.sqrt(fc_in)
    p["fc1_b"] = jax.random.normal(ks[13], (NSTATES[3],), jnp.float32) * 0.1
    p["fc2_w"] = jax.random.normal(ks[14], (NOUTPUTS, NSTATES[3]), jnp.float32) / jnp.sqrt(NSTATES[3])
    p["fc2_b"] = jax.random.normal(ks[15], (NOUTPUTS,), jnp.float32) * 0.1
    return p


if __name__ == "__main__":
    key = jax.random.PRNGKey(0)
    pkey, xkey = jax.random.split(key)
    params = init_params(pkey)
    # 24x24 input so the third pooled feature map is 2x2 = kernels[1]^2.
    x = jax.random.normal(xkey, (2, NFEATS, HIN, WIN), jnp.float32)

    out = jax.block_until_ready(jax.jit(dlc_forward)(x, params))
    assert out.shape == (2, NOUTPUTS), out.shape
    assert bool(jnp.all(jnp.isfinite(out)))

    ref = jax.block_until_ready(jax.jit(dlc_reference)(x, params))
    # bf16 MXU operands vs the f32 reference: expect ~1e-2 relative error; any
    # layout/indexing bug produces O(1) errors, so this tolerance is still tight.
    assert bool(jnp.allclose(out, ref, atol=5e-2, rtol=5e-2)), float(jnp.max(jnp.abs(out - ref)))

    print("KERNEL_OK")
</pallas_src>

<mosaic_0001>
module attributes {stable_mosaic.version = 11 : i64} {
  func.func @_dlc_kernel(%arg0: i32, %arg1: memref<1x4x768xf32, #tpu.memory_space<vmem>>, %arg2: memref<8x36xbf16, #tpu.memory_space<vmem>>, %arg3: memref<8x1xf32, #tpu.memory_space<vmem>>, %arg4: memref<16x32xbf16, #tpu.memory_space<vmem>>, %arg5: memref<16x1xf32, #tpu.memory_space<vmem>>, %arg6: memref<32x64xbf16, #tpu.memory_space<vmem>>, %arg7: memref<32x1xf32, #tpu.memory_space<vmem>>, %arg8: memref<64x128xbf16, #tpu.memory_space<vmem>>, %arg9: memref<64x1xf32, #tpu.memory_space<vmem>>, %arg10: memref<10x64xbf16, #tpu.memory_space<vmem>>, %arg11: memref<10x1xf32, #tpu.memory_space<vmem>>, %arg12: memref<10x128xf32, #tpu.memory_space<vmem>>) attributes {dimension_semantics = [#tpu.dimension_semantics<parallel>], iteration_bounds = array<i64: 2>, scalar_prefetch = 0 : i64, scratch_operands = 0 : i64, tpu.core_type = #tpu.core_type<tc>, window_params = [{transform_indices = @transform_0, window_bounds = array<i64: 1, 4, 768>}, {pipeline_mode = #tpu.pipeline_mode<synchronous>, transform_indices = @transform_1, window_bounds = array<i64: 8, 36>}, {pipeline_mode = #tpu.pipeline_mode<synchronous>, transform_indices = @transform_2, window_bounds = array<i64: 8, 1>}, {pipeline_mode = #tpu.pipeline_mode<synchronous>, transform_indices = @transform_3, window_bounds = array<i64: 16, 32>}, {pipeline_mode = #tpu.pipeline_mode<synchronous>, transform_indices = @transform_4, window_bounds = array<i64: 16, 1>}, {pipeline_mode = #tpu.pipeline_mode<synchronous>, transform_indices = @transform_5, window_bounds = array<i64: 32, 64>}, {pipeline_mode = #tpu.pipeline_mode<synchronous>, transform_indices = @transform_6, window_bounds = array<i64: 32, 1>}, {pipeline_mode = #tpu.pipeline_mode<synchronous>, transform_indices = @transform_7, window_bounds = array<i64: 64, 128>}, {pipeline_mode = #tpu.pipeline_mode<synchronous>, transform_indices = @transform_8, window_bounds = array<i64: 64, 1>}, {pipeline_mode = #tpu.pipeline_mode<synchronous>, transform_indices = @transform_9, window_bounds = array<i64: 10, 64>}, {pipeline_mode = #tpu.pipeline_mode<synchronous>, transform_indices = @transform_10, window_bounds = array<i64: 10, 1>}, {transform_indices = @transform_11, window_bounds = array<i64: 10, 128>}]} {
    %c0 = arith.constant 0 : index
    %c0_0 = arith.constant 0 : index
    %c0_1 = arith.constant 0 : index
    %0 = vector.load %arg1[%c0, %c0_0, %c0_1] : memref<1x4x768xf32, #tpu.memory_space<vmem>>, vector<1x4x768xf32>
    %1 = vector.shape_cast %0 : vector<1x4x768xf32> to vector<4x768xf32>
    %c767_i32 = arith.constant 767 : i32
    %2 = tpu.dynamic_rotate %1 by %c767_i32 dim 1 : vector<4x768xf32>, i32 -> vector<4x768xf32>
    %c766_i32 = arith.constant 766 : i32
    %3 = tpu.dynamic_rotate %1 by %c766_i32 dim 1 : vector<4x768xf32>, i32 -> vector<4x768xf32>
    %c742_i32 = arith.constant 742 : i32
    %4 = tpu.dynamic_rotate %1 by %c742_i32 dim 1 : vector<4x768xf32>, i32 -> vector<4x768xf32>
    %c741_i32 = arith.constant 741 : i32
    %5 = tpu.dynamic_rotate %1 by %c741_i32 dim 1 : vector<4x768xf32>, i32 -> vector<4x768xf32>
    %c740_i32 = arith.constant 740 : i32
    %6 = tpu.dynamic_rotate %1 by %c740_i32 dim 1 : vector<4x768xf32>, i32 -> vector<4x768xf32>
    %c716_i32 = arith.constant 716 : i32
    %7 = tpu.dynamic_rotate %1 by %c716_i32 dim 1 : vector<4x768xf32>, i32 -> vector<4x768xf32>
    %c715_i32 = arith.constant 715 : i32
    %8 = tpu.dynamic_rotate %1 by %c715_i32 dim 1 : vector<4x768xf32>, i32 -> vector<4x768xf32>
    %c714_i32 = arith.constant 714 : i32
    %9 = tpu.dynamic_rotate %1 by %c714_i32 dim 1 : vector<4x768xf32>, i32 -> vector<4x768xf32>
    %10 = tpu.concatenate %1, %2, %3, %4, %5, %6, %7, %8, %9 in 0 : vector<4x768xf32>, vector<4x768xf32>, vector<4x768xf32>, vector<4x768xf32>, vector<4x768xf32>, vector<4x768xf32>, vector<4x768xf32>, vector<4x768xf32>, vector<4x768xf32> -> vector<36x768xf32>
    %11 = arith.truncf %10 : vector<36x768xf32> to vector<36x768xbf16>
    %c0_2 = arith.constant 0 : index
    %c0_3 = arith.constant 0 : index
    %12 = vector.load %arg2[%c0_2, %c0_3] : memref<8x36xbf16, #tpu.memory_space<vmem>>, vector<8x36xbf16>
    %cst = arith.constant dense<0.000000e+00> : vector<8x768xf32>
    %13 = tpu.matmul %12, %11, %cst {dimension_numbers = #tpu.dot_dimension_numbers<[1], [0], [0], [1], [0, 0, 1, 1], [], []>} : vector<8x36xbf16>, vector<36x768xbf16>, vector<8x768xf32> -> vector<8x768xf32>
    %c0_4 = arith.constant 0 : index
    %c0_5 = arith.constant 0 : index
    %14 = vector.load %arg3[%c0_4, %c0_5] : memref<8x1xf32, #tpu.memory_space<vmem>>, vector<8x1xf32>
    %15 = vector.broadcast %14 : vector<8x1xf32> to vector<8x768xf32>
    %16 = arith.addf %13, %15 : vector<8x768xf32>
    %cst_6 = arith.constant 0.000000e+00 : f32
    %17 = vector.broadcast %cst_6 : f32 to vector<8x768xf32>
    %18 = arith.maximumf %16, %17 : vector<8x768xf32>
    %c767_i32_7 = arith.constant 767 : i32
    %19 = tpu.dynamic_rotate %18 by %c767_i32_7 dim 1 : vector<8x768xf32>, i32 -> vector<8x768xf32>
    %20 = arith.maximumf %18, %19 : vector<8x768xf32>
    %c742_i32_8 = arith.constant 742 : i32
    %21 = tpu.dynamic_rotate %18 by %c742_i32_8 dim 1 : vector<8x768xf32>, i32 -> vector<8x768xf32>
    %22 = arith.maximumf %20, %21 : vector<8x768xf32>
    %c741_i32_9 = arith.constant 741 : i32
    %23 = tpu.dynamic_rotate %18 by %c741_i32_9 dim 1 : vector<8x768xf32>, i32 -> vector<8x768xf32>
    %24 = arith.maximumf %22, %23 : vector<8x768xf32>
    %c766_i32_10 = arith.constant 766 : i32
    %25 = tpu.dynamic_rotate %24 by %c766_i32_10 dim 1 : vector<8x768xf32>, i32 -> vector<8x768xf32>
    %c716_i32_11 = arith.constant 716 : i32
    %26 = tpu.dynamic_rotate %24 by %c716_i32_11 dim 1 : vector<8x768xf32>, i32 -> vector<8x768xf32>
    %c714_i32_12 = arith.constant 714 : i32
    %27 = tpu.dynamic_rotate %24 by %c714_i32_12 dim 1 : vector<8x768xf32>, i32 -> vector<8x768xf32>
    %28 = tpu.concatenate %24, %25, %26, %27 in 0 : vector<8x768xf32>, vector<8x768xf32>, vector<8x768xf32>, vector<8x768xf32> -> vector<32x768xf32>
    %29 = arith.truncf %28 : vector<32x768xf32> to vector<32x768xbf16>
    %c0_13 = arith.constant 0 : index
    %c0_14 = arith.constant 0 : index
    %30 = vector.load %arg4[%c0_13, %c0_14] : memref<16x32xbf16, #tpu.memory_space<vmem>>, vector<16x32xbf16>
    %cst_15 = arith.constant dense<0.000000e+00> : vector<16x768xf32>
    %31 = tpu.matmul %30, %29, %cst_15 {dimension_numbers = #tpu.dot_dimension_numbers<[1], [0], [0], [1], [0, 0, 1, 1], [], []>} : vector<16x32xbf16>, vector<32x768xbf16>, vector<16x768xf32> -> vector<16x768xf32>
    %c0_16 = arith.constant 0 : index
    %c0_17 = arith.constant 0 : index
    %32 = vector.load %arg5[%c0_16, %c0_17] : memref<16x1xf32, #tpu.memory_space<vmem>>, vector<16x1xf32>
    %33 = vector.broadcast %32 : vector<16x1xf32> to vector<16x768xf32>
    %34 = arith.addf %31, %33 : vector<16x768xf32>
    %cst_18 = arith.constant 0.000000e+00 : f32
    %35 = vector.broadcast %cst_18 : f32 to vector<16x768xf32>
    %36 = arith.maximumf %34, %35 : vector<16x768xf32>
    %c766_i32_19 = arith.constant 766 : i32
    %37 = tpu.dynamic_rotate %36 by %c766_i32_19 dim 1 : vector<16x768xf32>, i32 -> vector<16x768xf32>
    %38 = arith.maximumf %36, %37 : vector<16x768xf32>
    %c716_i32_20 = arith.constant 716 : i32
    %39 = tpu.dynamic_rotate %36 by %c716_i32_20 dim 1 : vector<16x768xf32>, i32 -> vector<16x768xf32>
    %40 = arith.maximumf %38, %39 : vector<16x768xf32>
    %c714_i32_21 = arith.constant 714 : i32
    %41 = tpu.dynamic_rotate %36 by %c714_i32_21 dim 1 : vector<16x768xf32>, i32 -> vector<16x768xf32>
    %42 = arith.maximumf %40, %41 : vector<16x768xf32>
    %c764_i32 = arith.constant 764 : i32
    %43 = tpu.dynamic_rotate %42 by %c764_i32 dim 1 : vector<16x768xf32>, i32 -> vector<16x768xf32>
    %c664_i32 = arith.constant 664 : i32
    %44 = tpu.dynamic_rotate %42 by %c664_i32 dim 1 : vector<16x768xf32>, i32 -> vector<16x768xf32>
    %c660_i32 = arith.constant 660 : i32
    %45 = tpu.dynamic_rotate %42 by %c660_i32 dim 1 : vector<16x768xf32>, i32 -> vector<16x768xf32>
    %46 = tpu.concatenate %42, %43, %44, %45 in 0 : vector<16x768xf32>, vector<16x768xf32>, vector<16x768xf32>, vector<16x768xf32> -> vector<64x768xf32>
    %47 = arith.truncf %46 : vector<64x768xf32> to vector<64x768xbf16>
    %c0_22 = arith.constant 0 : index
    %c0_23 = arith.constant 0 : index
    %48 = vector.load %arg6[%c0_22, %c0_23] : memref<32x64xbf16, #tpu.memory_space<vmem>>, vector<32x64xbf16>
    %cst_24 = arith.constant dense<0.000000e+00> : vector<32x768xf32>
    %49 = tpu.matmul %48, %47, %cst_24 {dimension_numbers = #tpu.dot_dimension_numbers<[1], [0], [0], [1], [0, 0, 1, 1], [], []>} : vector<32x64xbf16>, vector<64x768xbf16>, vector<32x768xf32> -> vector<32x768xf32>
    %c0_25 = arith.constant 0 : index
    %c0_26 = arith.constant 0 : index
    %50 = vector.load %arg7[%c0_25, %c0_26] : memref<32x1xf32, #tpu.memory_space<vmem>>, vector<32x1xf32>
    %51 = vector.broadcast %50 : vector<32x1xf32> to vector<32x768xf32>
    %52 = arith.addf %49, %51 : vector<32x768xf32>
    %cst_27 = arith.constant 0.000000e+00 : f32
    %53 = vector.broadcast %cst_27 : f32 to vector<32x768xf32>
    %54 = arith.maximumf %52, %53 : vector<32x768xf32>
    %c764_i32_28 = arith.constant 764 : i32
    %55 = tpu.dynamic_rotate %54 by %c764_i32_28 dim 1 : vector<32x768xf32>, i32 -> vector<32x768xf32>
    %56 = arith.maximumf %54, %55 : vector<32x768xf32>
    %c664_i32_29 = arith.constant 664 : i32
    %57 = tpu.dynamic_rotate %54 by %c664_i32_29 dim 1 : vector<32x768xf32>, i32 -> vector<32x768xf32>
    %58 = arith.maximumf %56, %57 : vector<32x768xf32>
    %c660_i32_30 = arith.constant 660 : i32
    %59 = tpu.dynamic_rotate %54 by %c660_i32_30 dim 1 : vector<32x768xf32>, i32 -> vector<32x768xf32>
    %60 = arith.maximumf %58, %59 : vector<32x768xf32>
    %61 = vector.extract_strided_slice %60 {offsets = [0, 0], sizes = [32, 128], strides = [1, 1]} : vector<32x768xf32> to vector<32x128xf32>
    %c760_i32 = arith.constant 760 : i32
    %62 = tpu.dynamic_rotate %60 by %c760_i32 dim 1 : vector<32x768xf32>, i32 -> vector<32x768xf32>
    %63 = vector.extract_strided_slice %62 {offsets = [0, 0], sizes = [32, 128], strides = [1, 1]} : vector<32x768xf32> to vector<32x128xf32>
    %c560_i32 = arith.constant 560 : i32
    %64 = tpu.dynamic_rotate %60 by %c560_i32 dim 1 : vector<32x768xf32>, i32 -> vector<32x768xf32>
    %65 = vector.extract_strided_slice %64 {offsets = [0, 0], sizes = [32, 128], strides = [1, 1]} : vector<32x768xf32> to vector<32x128xf32>
    %c552_i32 = arith.constant 552 : i32
    %66 = tpu.dynamic_rotate %60 by %c552_i32 dim 1 : vector<32x768xf32>, i32 -> vector<32x768xf32>
    %67 = vector.extract_strided_slice %66 {offsets = [0, 0], sizes = [32, 128], strides = [1, 1]} : vector<32x768xf32> to vector<32x128xf32>
    %68 = tpu.concatenate %61, %63, %65, %67 in 0 : vector<32x128xf32>, vector<32x128xf32>, vector<32x128xf32>, vector<32x128xf32> -> vector<128x128xf32>
    %69 = arith.truncf %68 : vector<128x128xf32> to vector<128x128xbf16>
    %c0_31 = arith.constant 0 : index
    %c0_32 = arith.constant 0 : index
    %70 = vector.load %arg8[%c0_31, %c0_32] : memref<64x128xbf16, #tpu.memory_space<vmem>>, vector<64x128xbf16>
    %cst_33 = arith.constant dense<0.000000e+00> : vector<64x128xf32>
    %71 = tpu.matmul %70, %69, %cst_33 {dimension_numbers = #tpu.dot_dimension_numbers<[1], [0], [0], [1], [0, 0, 1, 1], [], []>} : vector<64x128xbf16>, vector<128x128xbf16>, vector<64x128xf32> -> vector<64x128xf32>
    %c0_34 = arith.constant 0 : index
    %c0_35 = arith.constant 0 : index
    %72 = vector.load %arg9[%c0_34, %c0_35] : memref<64x1xf32, #tpu.memory_space<vmem>>, vector<64x1xf32>
    %73 = vector.broadcast %72 : vector<64x1xf32> to vector<64x128xf32>
    %74 = arith.addf %71, %73 : vector<64x128xf32>
    %cst_36 = arith.constant 0.000000e+00 : f32
    %75 = vector.broadcast %cst_36 : f32 to vector<64x128xf32>
    %76 = arith.maximumf %74, %75 : vector<64x128xf32>
    %c0_37 = arith.constant 0 : index
    %c0_38 = arith.constant 0 : index
    %77 = vector.load %arg10[%c0_37, %c0_38] : memref<10x64xbf16, #tpu.memory_space<vmem>>, vector<10x64xbf16>
    %78 = arith.truncf %76 : vector<64x128xf32> to vector<64x128xbf16>
    %cst_39 = arith.constant dense<0.000000e+00> : vector<10x128xf32>
    %79 = tpu.matmul %77, %78, %cst_39 {dimension_numbers = #tpu.dot_dimension_numbers<[1], [0], [0], [1], [0, 0, 1, 1], [], []>} : vector<10x64xbf16>, vector<64x128xbf16>, vector<10x128xf32> -> vector<10x128xf32>
    %c0_40 = arith.constant 0 : index
    %c0_41 = arith.constant 0 : index
    %80 = vector.load %arg11[%c0_40, %c0_41] : memref<10x1xf32, #tpu.memory_space<vmem>>, vector<10x1xf32>
    %81 = vector.broadcast %80 : vector<10x1xf32> to vector<10x128xf32>
    %82 = arith.addf %79, %81 : vector<10x128xf32>
    %c0_42 = arith.constant 0 : index
    %c0_43 = arith.constant 0 : index
    %83 = vector.load %arg12[%c0_42, %c0_43] : memref<10x128xf32, #tpu.memory_space<vmem>>, vector<10x128xf32>
    tpu.vector_store %arg12[%c0_42, %c0_43], %82 {strides = array<i32>} : memref<10x128xf32, #tpu.memory_space<vmem>>, vector<10x128xf32>,
    return
  }
  func.func @transform_0(%arg0: i32) -> (i32, i32, i32) {
    %c0_i32 = arith.constant 0 : i32
    %c0_i32_0 = arith.constant 0 : i32
    %c0_i32_1 = arith.constant 0 : i32
    return %arg0, %c0_i32, %c0_i32_0 : i32, i32, i32
  }
  func.func @transform_1(%arg0: i32) -> (i32, i32) {
    %c0_i32 = arith.constant 0 : i32
    %c0_i32_0 = arith.constant 0 : i32
    %c0_i32_1 = arith.constant 0 : i32
    return %c0_i32, %c0_i32_0 : i32, i32
  }
  func.func @transform_2(%arg0: i32) -> (i32, i32) {
    %c0_i32 = arith.constant 0 : i32
    %c0_i32_0 = arith.constant 0 : i32
    %c0_i32_1 = arith.constant 0 : i32
    return %c0_i32, %c0_i32_0 : i32, i32
  }
  func.func @transform_3(%arg0: i32) -> (i32, i32) {
    %c0_i32 = arith.constant 0 : i32
    %c0_i32_0 = arith.constant 0 : i32
    %c0_i32_1 = arith.constant 0 : i32
    return %c0_i32, %c0_i32_0 : i32, i32
  }
  func.func @transform_4(%arg0: i32) -> (i32, i32) {
    %c0_i32 = arith.constant 0 : i32
    %c0_i32_0 = arith.constant 0 : i32
    %c0_i32_1 = arith.constant 0 : i32
    return %c0_i32, %c0_i32_0 : i32, i32
  }
  func.func @transform_5(%arg0: i32) -> (i32, i32) {
    %c0_i32 = arith.constant 0 : i32
    %c0_i32_0 = arith.constant 0 : i32
    %c0_i32_1 = arith.constant 0 : i32
    return %c0_i32, %c0_i32_0 : i32, i32
  }
  func.func @transform_6(%arg0: i32) -> (i32, i32) {
    %c0_i32 = arith.constant 0 : i32
    %c0_i32_0 = arith.constant 0 : i32
    %c0_i32_1 = arith.constant 0 : i32
    return %c0_i32, %c0_i32_0 : i32, i32
  }
  func.func @transform_7(%arg0: i32) -> (i32, i32) {
    %c0_i32 = arith.constant 0 : i32
    %c0_i32_0 = arith.constant 0 : i32
    %c0_i32_1 = arith.constant 0 : i32
    return %c0_i32, %c0_i32_0 : i32, i32
  }
  func.func @transform_8(%arg0: i32) -> (i32, i32) {
    %c0_i32 = arith.constant 0 : i32
    %c0_i32_0 = arith.constant 0 : i32
    %c0_i32_1 = arith.constant 0 : i32
    return %c0_i32, %c0_i32_0 : i32, i32
  }
  func.func @transform_9(%arg0: i32) -> (i32, i32) {
    %c0_i32 = arith.constant 0 : i32
    %c0_i32_0 = arith.constant 0 : i32
    %c0_i32_1 = arith.constant 0 : i32
    return %c0_i32, %c0_i32_0 : i32, i32
  }
  func.func @transform_10(%arg0: i32) -> (i32, i32) {
    %c0_i32 = arith.constant 0 : i32
    %c0_i32_0 = arith.constant 0 : i32
    %c0_i32_1 = arith.constant 0 : i32
    return %c0_i32, %c0_i32_0 : i32, i32
  }
  func.func @transform_11(%arg0: i32) -> (i32, i32) {
    %c0_i32 = arith.constant 0 : i32
    %c0_i32_0 = arith.constant 0 : i32
    return %c0_i32, %arg0 : i32, i32
  }
}

</mosaic_0001>

<bundles_post_ra>
// kernel: dlc_forward.1
= control target key start
LH: loop header
LB: loop body
LE: loop exit
PB: predicated region body
PF: predicated region fallthrough
CT: control target
= control target key end

     0   :  { %s2835_s17 = smov 0   ;;  %s2837_s18 = smov 0   ;;  %s4153_s0 = inlined_call_operand.vmem [shape: f32[2,4,768], index: 0, kind: input, shape index: {}]   ;;  %s4154_s1 = inlined_call_operand.vmem [shape: bf16[8,36], index: 1, kind: input, shape index: {}]   ;;  %s4155_s2 = inlined_call_operand.vmem [shape: f32[8,1], index: 2, kind: input, shape index: {}]   ;;  %s4156_s3 = inlined_call_operand.vmem [shape: bf16[16,32], index: 3, kind: input, shape index: {}]   ;;  %s4157_s4 = inlined_call_operand.vmem [shape: f32[16,1], index: 4, kind: input, shape index: {}]   ;;  %s4158_s5 = inlined_call_operand.vmem [shape: bf16[32,64], index: 5, kind: input, shape index: {}]   ;;  %s4159_s6 = inlined_call_operand.vmem [shape: f32[32,1], index: 6, kind: input, shape index: {}]   ;;  %s4160_s7 = inlined_call_operand.vmem [shape: bf16[64,128], index: 7, kind: input, shape index: {}]   ;;  %s4161_s8 = inlined_call_operand.vmem [shape: f32[64,1], index: 8, kind: input, shape index: {}]   ;;  %s4162_s9 = inlined_call_operand.vmem [shape: bf16[10,64], index: 9, kind: input, shape index: {}]   ;;  %s4163_s10 = inlined_call_operand.vmem [shape: f32[10,1], index: 10, kind: input, shape index: {}]   ;;  %s4164_s11 = inlined_call_operand.vmem [shape: f32[10,256], index: 11, kind: output, shape index: {}]  }
   0x1   :  { %s2839_s19 = smov 0  }
   0x2 LB: > { %s2848_s20 = sadd.s32 4294967295, %s2756_s19   ;;  %s2850_s21 = sadd.s32 1, %s2756_s19   ;;  %s2756_s19 = sphi %s2839_s19, %s4178_s19   ;;  %s2752_s18 = sphi %s2837_s18, %s4177_s18   ;;  %s2748_s17 = sphi %s2835_s17, %s4176_s17  }
   0x3   : > { %s261_s22 = ssub.s32 %s2756_s19, %s2850_s21  ;;  %s264_s23 = sadd.s32 1, %s2752_s18 }
   0x4   : > { %p262_p0 = scmp.eq.s32.totalorder %s261_s22, 0  ;;  %p274_p1 = scmp.ne.s32.totalorder %s2752_s18, %s2748_s17 }
   0x5   : > { %p275_p2 = scmp.eq.s32.totalorder %s2848_s20, 1  ;;  %p2087_p3 = scmp.ge.s32.totalorder %s2756_s19, 1 }
   0x6   : > { %s2858_s24 = scalar_select %p262_p0, %s2752_s18, %s264_s23  }
   0x7   : > { %p2860_p4 = por %p275_p2, %p274_p1  ;;  %p337_p5 = scmp.lt.s32.totalorder %s2756_s19, 3 }
   0x9   : > { %p338_p6 = pnand %p2087_p3, %p337_p5 }
   0xa   : > { %p376_p7 = scmp.lt.s32.totalorder (!%p338_p6), %s2848_s20, 1  ;;  %s2758_s12 = smov (!%p338_p6), 100  }
   0xb   : > { %341 = sbr.rel (%p338_p6) target bundleno = 2123 (0x84b), region = 64  ;;  %s2759_s13 = smov (!%p338_p6), 74  }
   0xc   : > { %s2760_s14 = smov (!%p338_p6), 75   ;;  %s2761_s15 = smov (!%p338_p6), 76  }
   0xd   : > { %s2762_s16 = smov (!%p338_p6), 101   ;;  %s2763_s19 = smov (!%p338_p6), 102  }
   0xe   : > { %s2764_s22 = smov (!%p338_p6), 127   ;;  %s2766_s23 = smov (!%p338_p6), 126  }
  0x10   : > { %s377_s26 = scalar_select %p376_p7, %s2848_s20, 1  ;;  %v2765_v8 = vmov 0   ;;  %v664_v12 = vld [vmem:[%s4155_s2] sm:$0xff]  ;;  %v406_v13 = vlaneseq  ;;  %vm674_vm1 = vcmask 1041408   ;;  %vm620_vm6 = vcmask 1043456  }
  0x11   : > { %725 = vmatprep.mubr.bf16.mxu0 %v2765_v8  ;;  %2291 = vset.pattern.permute.xlu0 %v2765_v8  ;;  %vm670_vm10 = vcmask 293888   ;;  %vm979_vm11 = vcmask 261120   ;;  %vm1397_vm15 = vcmask 523264  }
  0x12   : > { %s2169_s27 = smul.u32 24, %s377_s26  ;;  %1015 = vmatprep.mubr.bf16.mxu1 %v2765_v8  ;;  %2377 = vset.pattern.permute.xlu1 %v2765_v8  ;;  %v2957_v14 = vand.u32 127, %v406_v13 }
  0x14   : > { %s2869_s30 = scalar_lea.vmem %s4153_s0, %s2169_s27  ;;  %vm541_vm0 = vcmp.lt.s32.totalorder %v2957_v14, 74  ;;  %vm484_vm2 = vcmp.lt.s32.totalorder %v2957_v14, 100  ;;  %vm522_vm3 = vcmp.lt.s32.totalorder %v2957_v14, 75  ;;  %vm503_vm4 = vcmp.lt.s32.totalorder %v2957_v14, 76 }
  0x15   : > { %v2872_v0 = vld [vmem:[%s2869_s30] sm:$0xff]  ;;  %v2875_v1 = vld [vmem:[%s2869_s30 + $0x8] sm:$0xff]  ;;  %v2916_v9 = vld [vmem:[%s2869_s30 + $0x10] sm:$0xff]  ;;  %vm465_vm5 = vcmp.lt.s32.totalorder %v2957_v14, 101  ;;  %vm408_vm7 = vcmp.lt.s32.totalorder %v2957_v14, 127  ;;  %vm446_vm8 = vcmp.lt.s32.totalorder %v2957_v14, 102 }
  0x16   : > { %v2879_v2 = vcombine.high %v2872_v0, %v2872_v0  ;;  %v2883_v3 = vcombine.high %v2875_v1, %v2875_v1  ;;  %v2936_v11 = vcombine.high %v2916_v9, %v2916_v9  ;;  %vm427_vm9 = vcmp.lt.s32.totalorder %v2957_v14, 126 }
  0x17   : > { %vm1334_vm12 = vcmp.lt.s32.totalorder %v2957_v14, 20  ;;  %vm1305_vm13 = vcmp.lt.s32.totalorder %v2957_v14, 24  ;;  %vm1276_vm14 = vcmp.lt.s32.totalorder %v2957_v14, 124 }
  0x18   : > { %v2221_v4 = vpack.i.bf16 %v2875_v1, %v2879_v2  ;;  %v2211_v5 = vpack.i.bf16 %v2879_v2, %v2872_v0  ;;  %v2216_v6 = vpack.i.bf16 %v2883_v3, %v2875_v1  ;;  %v2236_v7 = vpack.i.bf16 %v2883_v3, %v2872_v0 }
  0x19   : > { %v2286_v10 = vpack.i.bf16 %v2916_v9, %v2883_v3 }
  0x1a   : > { %2222 = vrot.lane.b32.xlu1 %v2221_v4, %s2758_s12  ;;  %2212 = vrot.lane.b32.xlu0 %v2211_v5, %s2759_s13 }
  0x1e   : > { %2227 = vrot.lane.b32.xlu1 %v2221_v4, %s2760_s14  ;;  %2217 = vrot.lane.b32.xlu0 %v2216_v6, %s2759_s13 }
  0x22   : > { %2237 = vrot.lane.b32.xlu1 %v2236_v7, %s2760_s14  ;;  %2232 = vrot.lane.b32.xlu0 %v2236_v7, %s2758_s12 }
  0x26   : > { %2247 = vrot.lane.b32.xlu1 %v2221_v4, %s2761_s15  ;;  %2242 = vrot.lane.b32.xlu0 %v2221_v4, %s2762_s16 }
  0x2a   : > { %2257 = vrot.lane.b32.xlu1 %v2236_v7, %s2761_s15  ;;  %2252 = vrot.lane.b32.xlu0 %v2236_v7, %s2762_s16 }
  0x2e   : > { %2267 = vrot.lane.b32.xlu1 %v2221_v4, %s2763_s19  ;;  %2262 = vrot.lane.b32.xlu0 %v2221_v4, %s2764_s22 }
  0x32   : > { %434 = vrot.lane.b32.xlu1 %v2872_v0, %s2763_s19  ;;  %2272 = vrot.lane.b32.xlu0 %v2236_v7, %s2764_s22 }
  0x36   : > { %415 = vrot.lane.b32.xlu1 %v2872_v0, %s2766_s23  ;;  %2277 = vrot.lane.b32.xlu0 %v2221_v4, %s2766_s23 }
  0x3a   : > { %480 = vrot.lane.b32.xlu1 %v2916_v9, %s2758_s12  ;;  %537 = vrot.lane.b32.xlu0 %v2916_v9, %s2759_s13 }
  0x3e   : > { %461 = vrot.lane.b32.xlu1 %v2916_v9, %s2762_s16  ;;  %518 = vrot.lane.b32.xlu0 %v2916_v9, %s2760_s14 }
  0x42   : > { %402 = vrot.lane.b32.xlu1 %v2916_v9, %s2764_s22  ;;  %499 = vrot.lane.b32.xlu0 %v2916_v9, %s2761_s15 }
  0x46   : > { %2287 = vrot.lane.b32.xlu1 %v2286_v10, %s2766_s23  ;;  %2282 = vrot.lane.b32.xlu0 %v2286_v10, %s2763_s19 }
  0x4a   : > { %482 = vrot.lane.b32.xlu1 %v2936_v11, %s2758_s12  ;;  %539 = vrot.lane.b32.xlu0 %v2936_v11, %s2759_s13 }
  0x4e   : > { %463 = vrot.lane.b32.xlu1 %v2936_v11, %s2762_s16  ;;  %520 = vrot.lane.b32.xlu0 %v2936_v11, %s2760_s14  ;;  %s373_s14 = sand.u32 1, %s2748_s17  }
  0x52   : > { %404 = vrot.lane.b32.xlu1 %v2936_v11, %s2764_s22  ;;  %501 = vrot.lane.b32.xlu0 %v2936_v11, %s2761_s15 }
  0x56   : > { %425 = vrot.lane.b32.xlu1 %v2936_v11, %s2766_s23  ;;  %444 = vrot.lane.b32.xlu0 %v2936_v11, %s2763_s19 }
  0x5a   : > { %667 = vperm.xlu0 %2291, %v664_v12  }
  0x8c   : > { %v2959_v15 = vpop.permute.xlu1 %2222  ;;  %v2961_v16 = vpop.permute.xlu0 %2212 }
  0x8d   : > { %v2215_v17 = vunpack.i.h.bf16 %v2961_v16  ;;  %v2214_v18 = vunpack.i.l.bf16 %v2961_v16  ;;  %v2225_v23 = vunpack.i.h.bf16 %v2959_v15  ;;  %v2224_v25 = vunpack.i.l.bf16 %v2959_v15 }
  0x8f   : > { %v546_v19 = vsel %vm541_vm0, %v2214_v18, %v2215_v17  ;;  %v488_v33 = vsel %vm484_vm2, %v2224_v25, %v2225_v23 }
  0x90   : > { %v2970_v20 = vpop.permute.xlu1 %2227  ;;  %v2972_v21 = vpop.permute.xlu0 %2217  ;;  %v657_v24 = vpack.c.bf16 %v546_v19, %v546_v19  ;;  %v591_v43 = vrot.slane %v488_v33, 4 }
  0x91   : > { %v2219_v22 = vunpack.i.l.bf16 %v2972_v21  ;;  %v2230_v26 = vunpack.i.h.bf16 %v2970_v20  ;;  %v2229_v27 = vunpack.i.l.bf16 %v2970_v20 }
  0x92   : > { %v676_v32 = vsel %vm674_vm1, %v657_v24, 0  ;;  %v2220_v24 = vunpack.i.h.bf16 %v2972_v21 }
  0x93   : > { %v545_v28 = vsel %vm541_vm0, %v2215_v17, %v2219_v22  ;;  %v526_v34 = vsel %vm522_vm3, %v2229_v27, %v2230_v26 }
  0x94   : > { %v2985_v29 = vpop.permute.xlu1 %2237  ;;  %v2987_v30 = vpop.permute.xlu0 %2232  ;;  %v658_v31 = vpack.c.bf16 %v545_v28, %v545_v28  ;;  %v609_v44 = vrot.slane %v526_v34, 4 }
  0x95   : > { %v2239_v35 = vunpack.i.l.bf16 %v2985_v29  ;;  %v2234_v36 = vunpack.i.l.bf16 %v2987_v30 }
  0x96   : > { %2090 = vmatprep.subr.msk.bf16.mxu0 %vm674_vm1, %v658_v31 }
  0x97   : > { %704 = vmatpush1.bf16.msra.mxu0 %v676_v32  ;;  %v527_v45 = vsel %vm522_vm3, %v2239_v35, %v2229_v27  ;;  %v489_v46 = vsel %vm484_vm2, %v2234_v36, %v2224_v25 }
  0x98   : > { %v3001_v37 = vpop.permute.xlu1 %2247  ;;  %v3003_v38 = vpop.permute.xlu0 %2242  ;;  %v608_v55 = vrot.slane %v527_v45, 4  ;;  %v590_v56 = vrot.slane %v489_v46, 4  ;;  %v544_v45 = vsel %vm541_vm0, %v2219_v22, %v2220_v24  ;;  %v2240_v46 = vunpack.i.h.bf16 %v2985_v29 }
  0x99   : > { %v2250_v39 = vunpack.i.h.bf16 %v3001_v37  ;;  %v2249_v40 = vunpack.i.l.bf16 %v3001_v37  ;;  %v2245_v41 = vunpack.i.h.bf16 %v3003_v38  ;;  %v2244_v42 = vunpack.i.l.bf16 %v3003_v38 }
  0x9b   : > { %v469_v47 = vsel %vm465_vm5, %v2244_v42, %v2245_v41  ;;  %v507_v48 = vsel %vm503_vm4, %v2249_v40, %v2250_v39 }
  0x9c   : > { %v3027_v49 = vpop.permute.xlu1 %2257  ;;  %v3029_v50 = vpop.permute.xlu0 %2252  ;;  %v634_v51 = vsel %vm620_vm6, %v469_v47, %v591_v43  ;;  %v640_v52 = vsel %vm620_vm6, %v507_v48, %v609_v44  ;;  %v2235_v47 = vunpack.i.h.bf16 %v2987_v30 }
  0x9d   : > { %v2259_v53 = vunpack.i.l.bf16 %v3027_v49  ;;  %v2254_v54 = vunpack.i.l.bf16 %v3029_v50  ;;  %v652_v57 = vpack.c.bf16 %v640_v52, %v634_v51 }
  0x9f   : > { %v470_v58 = vsel %vm465_vm5, %v2254_v54, %v2244_v42  ;;  %v508_v59 = vsel %vm503_vm4, %v2259_v53, %v2249_v40  ;;  %705 = vmatprep.subr.bf16.mxu0 %v652_v57 }
  0xa0   : > { %v3043_v60 = vpop.permute.xlu1 %2267  ;;  %v3045_v61 = vpop.permute.xlu0 %2262  ;;  %v633_v62 = vsel %vm620_vm6, %v470_v58, %v590_v56  ;;  %v639_v63 = vsel %vm620_vm6, %v508_v59, %v608_v55 }
  0xa1   : > { %v2265_v4 = vunpack.i.h.bf16 %v3045_v61  ;;  %v2264_v5 = vunpack.i.l.bf16 %v3045_v61  ;;  %v651_v6 = vpack.c.bf16 %v639_v63, %v633_v62  ;;  %v2270_v7 = vunpack.i.h.bf16 %v3043_v60 }
  0xa2   : > { %v2269_v10 = vunpack.i.l.bf16 %v3043_v60  ;;  %v2260_v63 = vunpack.i.h.bf16 %v3027_v49 }
  0xa3   : > { %706 = vmatpush1.bf16.msra.mxu0 %v651_v6  ;;  %v412_v17 = vsel %vm408_vm7, %v2264_v5, %v2265_v4 }
  0xa4   : > { %v3055_v12 = vpop.permute.xlu1 %434  ;;  %v3057_v13 = vpop.permute.xlu0 %2272  ;;  %v450_v25 = vsel %vm446_vm8, %v2269_v10, %v2270_v7  ;;  %v555_v31 = vrot.slane %v412_v17, 4 }
  0xa5   : > { %v2274_v19 = vunpack.i.l.bf16 %v3057_v13  ;;  %v451_v27 = vsel %vm446_vm8, %v3055_v12, %v2269_v10  ;;  %v573_v43 = vrot.slane %v450_v25, 4  ;;  %v659_v10 = vpack.c.bf16 %v544_v45, %v544_v45  ;;  %v3124_v25 = vld [vmem:[%s4154_s1] sm:$0xf] }
  0xa6   : > { %v572_v44 = vrot.slane %v451_v27, 4  ;;  %v622_v21 = vsel %vm620_vm6, %v2879_v2, %v555_v31  ;;  %v487_v2 = vsel %vm484_vm2, %v2225_v23, %v2235_v47  ;;  %v506_v23 = vsel %vm503_vm4, %v2250_v39, %v2260_v63 }
  0xa7   : > { %v413_v28 = vsel %vm408_vm7, %v2274_v19, %v2264_v5  ;;  %v2255_v5 = vunpack.i.h.bf16 %v3029_v50  ;;  %v682_v27 = vsel %vm674_vm1, %v659_v10, 0  ;;  %v592_v31 = vrot.slane %v487_v2, 4 }
  0xa8   : > { %v554_v32 = vrot.slane %v413_v28, 4  ;;  %v3076_v33 = vpop.permute.xlu1 %415  ;;  %v3078_v34 = vpop.permute.xlu0 %2277 }
  0xa9   : > { %v2280_v40 = vunpack.i.h.bf16 %v3078_v34  ;;  %v2279_v42 = vunpack.i.l.bf16 %v3078_v34 }
  0xaa   : > { %v621_v56 = vsel %vm620_vm6, %v2872_v0, %v554_v32  ;;  %v525_v0 = vsel %vm522_vm3, %v2230_v26, %v2240_v46  ;;  %v468_v26 = vsel %vm465_vm5, %v2245_v41, %v2255_v5  ;;  %v2275_v32 = vunpack.i.h.bf16 %v3057_v13 }
  0xab   : > { %v431_v48 = vsel %vm427_vm9, %v2279_v42, %v2280_v40  ;;  %v432_v51 = vsel %vm427_vm9, %v3076_v33, %v2279_v42  ;;  %v610_v28 = vrot.slane %v525_v0, 4 }
  0xac   : > { %v3096_v52 = vpop.permute.xlu1 %480  ;;  %v3098_v55 = vpop.permute.xlu0 %537  ;;  %v628_v22 = vsel %vm620_vm6, %v431_v48, %v573_v43  ;;  %v627_v57 = vsel %vm620_vm6, %v432_v51, %v572_v44  ;;  %v635_v44 = vsel %vm620_vm6, %v468_v26, %v592_v31  ;;  %v411_v48 = vsel %vm408_vm7, %v2265_v4, %v2275_v32 }
  0xad   : > { %v543_v58 = vsel %vm541_vm0, %v2220_v24, %v3098_v55  ;;  %v646_v59 = vpack.c.bf16 %v628_v22, %v622_v21  ;;  %v645_v62 = vpack.c.bf16 %v627_v57, %v621_v56  ;;  %v486_v20 = vsel %vm484_vm2, %v2235_v47, %v3096_v52 }
  0xae   : > { %v660_v6 = vpack.c.bf16 %v543_v58, %v543_v58  ;;  %v593_v37 = vrot.slane %v486_v20, 4  ;;  %v641_v45 = vsel %vm620_vm6, %v506_v23, %v610_v28  ;;  %v556_v61 = vrot.slane %v411_v48, 4 }
  0xaf   : > { %707 = vmatprep.subr.bf16.mxu0 %v646_v59  ;;  %v653_v57 = vpack.c.bf16 %v641_v45, %v635_v44 }
  0xb0   : > { %v3119_v17 = vpop.permute.xlu1 %461  ;;  %v519_v24 = vpop.permute.xlu0 %518  ;;  %708 = vmatpush1.bf16.msra.mxu0 %v645_v62 }
  0xb1   : > { %v524_v15 = vsel %vm522_vm3, %v2240_v46, %v519_v24  ;;  %2092 = vmatprep.subr.msk.bf16.mxu0 %vm674_vm1, %v660_v6  ;;  %v467_v42 = vsel %vm465_vm5, %v2255_v5, %v3119_v17 }
  0xb2   : > { %v611_v39 = vrot.slane %v524_v15, 4  ;;  %v636_v46 = vsel %vm620_vm6, %v467_v42, %v593_v37 }
  0xb3   : > { %2091 = vmatmul.mubr.msk.bf16.vlgmr.msra.gmra.mxu0 %vm670_vm10, %v3124_v25 }
  0xb4   : > { %v403_v43 = vpop.permute.xlu1 %402  ;;  %v500_v38 = vpop.permute.xlu0 %499  ;;  %745 = vmatpush1.bf16.msra.mxu0 %v682_v27  ;;  %766 = vmatprep.mubr.bf16.mxu0 %v2765_v8 }
  0xb5   : > { %v505_v41 = vsel %vm503_vm4, %v2260_v63, %v500_v38  ;;  %v410_v21 = vsel %vm408_vm7, %v2275_v32, %v403_v43 }
  0xb6   : > { %v642_v47 = vsel %vm620_vm6, %v505_v41, %v611_v39  ;;  %v557_v4 = vrot.slane %v410_v21, 4 }
  0xb7   : > { %v654_v51 = vpack.c.bf16 %v642_v47, %v636_v46 }
  0xb8   : > { %v3160_v22 = vpop.permute.xlu1 %2287  ;;  %v3162_v56 = vpop.permute.xlu0 %2282  ;;  %v624_v27 = vsel %vm620_vm6, %v2883_v3, %v557_v4 }
  0xb9   : > { %v2290_v58 = vunpack.i.h.bf16 %v3160_v22  ;;  %v2285_v59 = vunpack.i.h.bf16 %v3162_v56  ;;  %v2284_v62 = vunpack.i.l.bf16 %v3162_v56  ;;  %746 = vmatprep.subr.bf16.mxu0 %v654_v51  ;;  %v2289_v63 = vunpack.i.l.bf16 %v3160_v22 }
  0xba   : > { %747 = vmatpush1.bf16.msra.mxu0 %v653_v57 }
  0xbb   : > { %v448_v5 = vsel %vm446_vm8, %v2284_v62, %v2285_v59  ;;  %v449_v6 = vsel %vm446_vm8, %v2270_v7, %v2284_v62  ;;  %v429_v15 = vsel %vm427_vm9, %v2289_v63, %v2290_v58  ;;  %v430_v60 = vsel %vm427_vm9, %v2280_v40, %v2289_v63 }
  0xbc   : > { %v574_v10 = vrot.slane %v449_v6, 4  ;;  %v575_v0 = vrot.slane %v448_v5, 4  ;;  %v483_v2 = vpop.permute.xlu1 %482  ;;  %v540_v20 = vpop.permute.xlu0 %539  ;;  %v623_v7 = vsel %vm620_vm6, %v2875_v1, %v556_v61 }
  0xbd   : > { %v542_v23 = vsel %vm541_vm0, %v3098_v55, %v540_v20  ;;  %v547_v26 = vsel %vm541_vm0, %v540_v20, %v2214_v18  ;;  %v485_v34 = vsel %vm484_vm2, %v3096_v52, %v483_v2  ;;  %v490_v16 = vsel %vm484_vm2, %v483_v2, %v2234_v36 }
  0xbe   : > { %v630_v28 = vsel %vm620_vm6, %v429_v15, %v575_v0  ;;  %v629_v55 = vsel %vm620_vm6, %v430_v60, %v574_v10  ;;  %v661_v40 = vpack.c.bf16 %v542_v23, %v542_v23  ;;  %v662_v37 = vpack.c.bf16 %v547_v26, %v547_v26 }
  0xbf   : > { %v648_v1 = vpack.c.bf16 %v630_v28, %v624_v27  ;;  %v647_v42 = vpack.c.bf16 %v629_v55, %v623_v7  ;;  %v594_v52 = vrot.slane %v485_v34, 4  ;;  %v595_v36 = vrot.slane %v490_v16, 4 }
  0xc0   : > { %v464_v31 = vpop.permute.xlu1 %463  ;;  %v521_v32 = vpop.permute.xlu0 %520  ;;  %v688_v44 = vsel %vm674_vm1, %v661_v40, 0  ;;  %vm1710_vm2 = vcmp.lt.s32.totalorder %v2957_v14, 120 }
  0xc1   : > { %v523_v3 = vsel %vm522_vm3, %v519_v24, %v521_v32  ;;  %v528_v18 = vsel %vm522_vm3, %v521_v32, %v2239_v35  ;;  %748 = vmatprep.subr.bf16.mxu0 %v648_v1  ;;  %v466_v39 = vsel %vm465_vm5, %v3119_v17, %v464_v31  ;;  %v471_v30 = vsel %vm465_vm5, %v464_v31, %v2254_v54 }
  0xc2   : > { %749 = vmatpush1.bf16.msra.mxu0 %v647_v42  ;;  %v612_v24 = vrot.slane %v523_v3, 4  ;;  %v613_v41 = vrot.slane %v528_v18, 4  ;;  %v637_v46 = vsel %vm620_vm6, %v466_v39, %v594_v52  ;;  %v638_v13 = vsel %vm620_vm6, %v471_v30, %v595_v36 }
  0xc3   : > { %2094 = vmatprep.subr.msk.bf16.mxu0 %vm674_vm1, %v662_v37  ;;  %vm1731_vm1 = vcmp.lt.s32.totalorder %v2957_v14, 48  ;;  %vm2774_vm3 = vmmov 0  }
  0xc4   : > { %v405_v29 = vpop.permute.xlu1 %404  ;;  %v502_v35 = vpop.permute.xlu0 %501 }
  0xc5   : > { %v409_v45 = vsel %vm408_vm7, %v403_v43, %v405_v29  ;;  %v414_v50 = vsel %vm408_vm7, %v405_v29, %v2274_v19  ;;  %v504_v54 = vsel %vm503_vm4, %v500_v38, %v502_v35  ;;  %v509_v17 = vsel %vm503_vm4, %v502_v35, %v2259_v53  ;;  %2093 = vmatmul.mubr.msk.bf16.vlgmr.msra.gmra.mxu0 %vm670_vm10, %v3124_v25 }
  0xc6   : > { %v643_v47 = vsel %vm620_vm6, %v504_v54, %v612_v24  ;;  %v644_v43 = vsel %vm620_vm6, %v509_v17, %v613_v41  ;;  %786 = vmatpush1.bf16.msra.mxu0 %v688_v44  ;;  %807 = vmatprep.mubr.bf16.mxu0 %v2765_v8  ;;  %v558_v49 = vrot.slane %v409_v45, 4  ;;  %v559_v38 = vrot.slane %v414_v50, 4 }
  0xc7   : > { %v655_v19 = vpack.c.bf16 %v643_v47, %v637_v46  ;;  %v656_v48 = vpack.c.bf16 %v644_v43, %v638_v13 }
  0xc8   : > { %v426_v51 = vpop.permute.xlu1 %425  ;;  %v445_v53 = vpop.permute.xlu0 %444 }
  0xc9   : > { %v447_v21 = vsel %vm446_vm8, %v2285_v59, %v445_v53  ;;  %v452_v56 = vsel %vm446_vm8, %v445_v53, %v3055_v12  ;;  %787 = vmatprep.subr.bf16.mxu0 %v656_v48  ;;  %v428_v61 = vsel %vm427_vm9, %v2290_v58, %v426_v51  ;;  %v433_v63 = vsel %vm427_vm9, %v426_v51, %v3076_v33 }
  0xca   : > { %v576_v57 = vrot.slane %v447_v21, 4  ;;  %v577_v62 = vrot.slane %v452_v56, 4  ;;  %788 = vmatpush1.bf16.msra.mxu0 %v655_v19  ;;  %v625_v59 = vsel %vm620_vm6, %v2916_v9, %v558_v49  ;;  %v626_v12 = vsel %vm620_vm6, %v2936_v11, %v559_v38 }
  0xcc   : > { %v631_v4 = vsel %vm620_vm6, %v428_v61, %v576_v57  ;;  %v632_v5 = vsel %vm620_vm6, %v433_v63, %v577_v62 }
  0xcd   : > { %v650_v6 = vpack.c.bf16 %v632_v5, %v626_v12  ;;  %v649_v22 = vpack.c.bf16 %v631_v4, %v625_v59 }
  0xcf   : > { %789 = vmatprep.subr.bf16.mxu0 %v650_v6 }
  0xd0   : > { %790 = vmatpush1.bf16.msra.mxu0 %v649_v22 }
  0xd3   : > { %2095 = vmatmul.mubr.msk.bf16.vlgmr.msra.gmra.mxu0 %vm670_vm10, %v3124_v25 }
  0xd4   : > { %1101 = vmatprep.mubr.bf16.mxu0 %v2765_v8 }
  0xd5   : > { %v668_v0 = vpop.permute.xlu0 %667 }
 0x173   : > { %v727_v33 = vpop.f32.mrf.mxu0 }
 0x174   : > { %v728_v26 = vadd.f32 %v727_v33, %v668_v0 }
 0x175   : > { %v729_v58 = vpop.f32.mrf.mxu0 }
 0x176   : > { %v730_v2 = vadd.f32 %v729_v58, %v668_v0  ;;  %v816_v34 = vmax.f32 %v728_v26, 0.0 }
 0x177   : > { %v731_v10 = vpop.f32.mrf.mxu0 }
 0x178   : > { %v817_v7 = vmax.f32 %v730_v2, 0.0 }
 0x179   : > { %v732_v9 = vpop.f32.mrf.mxu0 }
 0x185   : > { %v768_v20 = vpop.f32.mrf.mxu0 }
 0x186   : > { %v769_v15 = vadd.f32 %v768_v20, %v668_v0 }
 0x187   : > { %v770_v11 = vpop.f32.mrf.mxu0 }
 0x188   : > { %v818_v23 = vmax.f32 %v769_v15, 0.0  ;;  %v3257_v60 = vadd.f32 %v770_v11, %v668_v0 }
 0x189   : > { %v772_v27 = vpop.f32.mrf.mxu0 }
 0x18a   : > { %v819_v28 = vmax.f32 %v3257_v60, 0.0  ;;  %v2297_v25 = vpack.i.bf16 %v818_v23, %v817_v7 }
 0x18b   : > { %v773_v55 = vpop.f32.mrf.mxu0 }
 0x18c   : > { %2298 = vrot.lane.b32.xlu0 %v2297_v25, %s2763_s19  ;;  %2293 = vrot.lane.b32.xlu1 %v2297_v25, %s2764_s22  ;;  %v2307_v40 = vpack.i.bf16 %v816_v34, %v819_v28 }
 0x190   : > { %2303 = vrot.lane.b32.xlu0 %v2297_v25, %s2762_s16  ;;  %2308 = vrot.lane.b32.xlu1 %v2307_v40, %s2764_s22 }
 0x193   : > { %v809_v31 = vpop.f32.mrf.mxu0 }
 0x194   : > { %v3266_v32 = vadd.f32 %v809_v31, %v668_v0  ;;  %2313 = vrot.lane.b32.xlu1 %v2307_v40, %s2763_s19 }
 0x195   : > { %v811_v1 = vpop.f32.mrf.mxu0 }
 0x196   : > { %v812_v42 = vadd.f32 %v811_v1, %v668_v0  ;;  %v820_v3 = vmax.f32 %v3266_v32, 0.0 }
 0x197   : > { %v813_v16 = vpop.f32.mrf.mxu0 }
 0x198   : > { %v821_v18 = vmax.f32 %v812_v42, 0.0  ;;  %2318 = vrot.lane.b32.xlu1 %v2307_v40, %s2762_s16 }
 0x199   : > { %v814_v37 = vpop.f32.mrf.mxu0 }
 0x19a   : > { %v2322_v52 = vpack.i.bf16 %v821_v18, %v820_v3 }
 0x19c   : > { %2323 = vrot.lane.b32.xlu0 %v2322_v52, %s2764_s22  ;;  %2328 = vrot.lane.b32.xlu1 %v2322_v52, %s2763_s19  ;;  %s2113_s22 = sshll.u32 (%p2860_p4), %s2848_s20, 3 }
 0x19d   : > { %s1995_s27 = scalar_lea.vmem (%p2860_p4), %s4164_s11, %s2113_s22 }
 0x1a0   : > { %2333 = vrot.lane.b32.xlu0 %v2322_v52, %s2762_s16  ;;  %s2088_s16 = sshll.u32 %s373_s14, 4 }
 0x1a1   : > { %s375_s19 = scalar_lea.vmem [#allocation2], %s2088_s16 }
 0x1fe   : > { %v2299_v39 = vpop.permute.xlu0 %2298  ;;  %v2294_v30 = vpop.permute.xlu1 %2293 }
 0x1ff   : > { %v2296_v36 = vunpack.i.h.bf16 %v2294_v30  ;;  %v2295_v24 = vunpack.i.l.bf16 %v2294_v30  ;;  %v2301_v45 = vunpack.i.h.bf16 %v2299_v39  ;;  %v2300_v50 = vunpack.i.l.bf16 %v2299_v39 }
 0x201   : > { %v837_v41 = vsel %vm408_vm7, %v2295_v24, %v2296_v36  ;;  %v861_v19 = vsel %vm446_vm8, %v2300_v50, %v2301_v45 }
 0x202   : > { %v2309_v29 = vpop.permute.xlu1 %2308  ;;  %v2304_v35 = vpop.permute.xlu0 %2303  ;;  %v841_v54 = vmax.f32 %v817_v7, %v837_v41 }
 0x203   : > { %v2310_v44 = vunpack.i.l.bf16 %v2309_v29  ;;  %v2306_v17 = vunpack.i.h.bf16 %v2304_v35  ;;  %v2305_v46 = vunpack.i.l.bf16 %v2304_v35  ;;  %v2311_v48 = vunpack.i.h.bf16 %v2309_v29  ;;  %v963_v29 = vld [vmem:[%s4157_s4 + $0x8] sm:$0xff]  ;;  %v962_v35 = vld [vmem:[%s4157_s4] sm:$0xff] }
 0x204   : > { %v865_v49 = vmax.f32 %v841_v54, %v861_v19 }
 0x205   : > { %v836_v13 = vsel %vm408_vm7, %v2296_v36, %v2310_v44  ;;  %v885_v53 = vsel %vm465_vm5, %v2305_v46, %v2306_v17  ;;  %v838_v62 = vsel %vm408_vm7, %v2311_v48, %v2295_v24 }
 0x206   : > { %v2314_v47 = vpop.permute.xlu1 %2313  ;;  %v842_v21 = vmax.f32 %v818_v23, %v836_v13  ;;  %v3286_v63 = vmax.f32 %v865_v49, %v885_v53  ;;  %v840_v10 = vmax.f32 %v816_v34, %v838_v62 }
 0x207   : > { %v2315_v43 = vunpack.i.l.bf16 %v2314_v47  ;;  %v2316_v38 = vunpack.i.h.bf16 %v2314_v47 }
 0x209   : > { %v860_v51 = vsel %vm446_vm8, %v2301_v45, %v2315_v43  ;;  %v862_v59 = vsel %vm446_vm8, %v2316_v38, %v2300_v50 }
 0x20a   : > { %v2319_v56 = vpop.permute.xlu1 %2318  ;;  %v866_v61 = vmax.f32 %v842_v21, %v860_v51  ;;  %v864_v11 = vmax.f32 %v840_v10, %v862_v59 }
 0x20b   : > { %v2320_v57 = vunpack.i.l.bf16 %v2319_v56  ;;  %v2321_v5 = vunpack.i.h.bf16 %v2319_v56 }
 0x20d   : > { %v884_v4 = vsel %vm465_vm5, %v2306_v17, %v2320_v57  ;;  %v886_v26 = vsel %vm465_vm5, %v2321_v5, %v2305_v46 }
 0x20e   : > { %v2324_v12 = vpop.permute.xlu0 %2323  ;;  %v3292_v6 = vmax.f32 %v866_v61, %v884_v4  ;;  %v2329_v58 = vpop.permute.xlu1 %2328  ;;  %v3311_v60 = vmax.f32 %v864_v11, %v886_v26 }
 0x20f   : > { %v2326_v22 = vunpack.i.h.bf16 %v2324_v12  ;;  %v2325_v33 = vunpack.i.l.bf16 %v2324_v12  ;;  %v2330_v9 = vunpack.i.l.bf16 %v2329_v58  ;;  %v2331_v27 = vunpack.i.h.bf16 %v2329_v58 }
 0x210   : > { %v2342_v15 = vpack.i.bf16 %v3292_v6, %v3286_v63 }
 0x211   : > { %v834_v0 = vsel %vm408_vm7, %v2325_v33, %v2326_v22  ;;  %v835_v2 = vsel %vm408_vm7, %v2310_v44, %v2325_v33  ;;  %v839_v20 = vsel %vm408_vm7, %v2326_v22, %v2311_v48  ;;  %v859_v25 = vsel %vm446_vm8, %v2315_v43, %v2330_v9 }
 0x212   : > { %v843_v23 = vmax.f32 %v819_v28, %v835_v2  ;;  %v2334_v7 = vpop.permute.xlu0 %2333  ;;  %2343 = vrot.lane.b32.xlu0 %v2342_v15, %s2759_s13  ;;  %v844_v34 = vmax.f32 %v820_v3, %v834_v0  ;;  %v845_v40 = vmax.f32 %v821_v18, %v839_v20  ;;  %2338 = vrot.lane.b32.xlu1 %v2342_v15, %s2761_s15 }
 0x213   : > { %v2335_v55 = vunpack.i.l.bf16 %v2334_v7  ;;  %v2336_v32 = vunpack.i.h.bf16 %v2334_v7  ;;  %v858_v42 = vsel %vm446_vm8, %v2330_v9, %v2331_v27  ;;  %v863_v16 = vsel %vm446_vm8, %v2331_v27, %v2316_v38  ;;  %v2726_v7 = vld [vmem:[%s4156_s3] sm:$0xff]  }
 0x214   : > { %v867_v31 = vmax.f32 %v843_v23, %v859_v25  ;;  %v868_v37 = vmax.f32 %v844_v34, %v858_v42  ;;  %v869_v3 = vmax.f32 %v845_v40, %v863_v16 }
 0x215   : > { %v883_v1 = vsel %vm465_vm5, %v2320_v57, %v2335_v55  ;;  %v882_v52 = vsel %vm465_vm5, %v2335_v55, %v2336_v32  ;;  %v887_v39 = vsel %vm465_vm5, %v2336_v32, %v2321_v5 }
 0x216   : > { %v3313_v28 = vmax.f32 %v867_v31, %v883_v1  ;;  %v3328_v30 = vmax.f32 %v868_v37, %v882_v52  ;;  %v3330_v36 = vmax.f32 %v869_v3, %v887_v39 }
 0x218   : > { %v2357_v18 = vpack.i.bf16 %v3313_v28, %v3311_v60  ;;  %v2367_v24 = vpack.i.bf16 %v3330_v36, %v3328_v30  ;;  %v2372_v41 = vpack.i.bf16 %v3328_v30, %v3313_v28 }
 0x21a   : > { %2358 = vrot.lane.b32.xlu0 %v2357_v18, %s2759_s13  ;;  %2348 = vrot.lane.b32.xlu1 %v2357_v18, %s2761_s15 }
 0x21e   : > { %894 = vrot.lane.b32.xlu0 %v3311_v60, %s2766_s23  ;;  %2353 = vrot.lane.b32.xlu1 %v2342_v15, %s2766_s23 }
 0x222   : > { %2368 = vrot.lane.b32.xlu0 %v2367_v24, %s2759_s13  ;;  %2363 = vrot.lane.b32.xlu1 %v2367_v24, %s2761_s15 }
 0x226   : > { %904 = vrot.lane.b32.xlu0 %v3330_v36, %s2766_s23  ;;  %2373 = vrot.lane.b32.xlu1 %v2372_v41, %s2766_s23 }
 0x22a   : > { %971 = vperm.xlu0 %2291, %v963_v29   ;;  %966 = vperm.xlu1 %2377, %v962_v35  }
 0x284   : > { %v2344_v44 = vpop.permute.xlu0 %2343  ;;  %v2339_v54 = vpop.permute.xlu1 %2338 }
 0x285   : > { %v2346_v45 = vunpack.i.h.bf16 %v2344_v44  ;;  %v2345_v50 = vunpack.i.l.bf16 %v2344_v44  ;;  %v2341_v17 = vunpack.i.h.bf16 %v2339_v54  ;;  %v2340_v46 = vunpack.i.l.bf16 %v2339_v54 }
 0x287   : > { %v945_v47 = vsel %vm541_vm0, %v2345_v50, %v2346_v45  ;;  %v927_v13 = vsel %vm503_vm4, %v2340_v46, %v2341_v17 }
 0x288   : > { %v955_v43 = vpack.c.bf16 %v945_v47, %v927_v13 }
 0x28a   : > { %995 = vmatprep.subr.bf16.mxu1 %v955_v43 }
 0x28c   : > { %v2359_v19 = vpop.permute.xlu0 %2358  ;;  %v2349_v48 = vpop.permute.xlu1 %2348 }
 0x28d   : > { %v2360_v49 = vunpack.i.l.bf16 %v2359_v19  ;;  %v2350_v38 = vunpack.i.l.bf16 %v2349_v48  ;;  %v2361_v51 = vunpack.i.h.bf16 %v2359_v19  ;;  %v2351_v53 = vunpack.i.h.bf16 %v2349_v48 }
 0x28f   : > { %v928_v21 = vsel %vm503_vm4, %v2350_v38, %v2340_v46  ;;  %v946_v56 = vsel %vm541_vm0, %v2360_v49, %v2345_v50  ;;  %v944_v12 = vsel %vm541_vm0, %v2346_v45, %v2361_v51  ;;  %v926_v5 = vsel %vm503_vm4, %v2341_v17, %v2351_v53 }
 0x290   : > { %v895_v57 = vpop.permute.xlu0 %894  ;;  %v2354_v62 = vpop.permute.xlu1 %2353  ;;  %v954_v61 = vpack.c.bf16 %v946_v56, %v928_v21  ;;  %v956_v23 = vpack.c.bf16 %v944_v12, %v926_v5 }
 0x291   : > { %v2356_v59 = vunpack.i.h.bf16 %v2354_v62  ;;  %v2355_v4 = vunpack.i.l.bf16 %v2354_v62 }
 0x292   : > { %996 = vmatpush1.bf16.msra.mxu1 %v954_v61 }
 0x293   : > { %v909_v22 = vsel %vm427_vm9, %v2355_v4, %v2356_v59  ;;  %v910_v33 = vsel %vm427_vm9, %v895_v57, %v2355_v4 }
 0x294   : > { %v2369_v58 = vpop.permute.xlu0 %2368  ;;  %v2364_v10 = vpop.permute.xlu1 %2363  ;;  %v949_v9 = vpack.c.bf16 %v909_v22, %v3286_v63  ;;  %v948_v0 = vpack.c.bf16 %v910_v33, %v3311_v60 }
 0x295   : > { %v2371_v2 = vunpack.i.h.bf16 %v2369_v58  ;;  %v2370_v20 = vunpack.i.l.bf16 %v2369_v58  ;;  %v2366_v15 = vunpack.i.h.bf16 %v2364_v10  ;;  %v2365_v11 = vunpack.i.l.bf16 %v2364_v10 }
 0x296   : > { %997 = vmatprep.subr.bf16.mxu1 %v949_v9 }
 0x297   : > { %v942_v26 = vsel %vm541_vm0, %v2370_v20, %v2371_v2  ;;  %v924_v27 = vsel %vm503_vm4, %v2365_v11, %v2366_v15  ;;  %998 = vmatpush1.bf16.msra.mxu1 %v948_v0  ;;  %v925_v63 = vsel %vm503_vm4, %v2351_v53, %v2365_v11  ;;  %v943_v25 = vsel %vm541_vm0, %v2361_v51, %v2370_v20 }
 0x298   : > { %v958_v55 = vpack.c.bf16 %v942_v26, %v924_v27  ;;  %v905_v34 = vpop.permute.xlu0 %904  ;;  %v2374_v40 = vpop.permute.xlu1 %2373  ;;  %v957_v31 = vpack.c.bf16 %v943_v25, %v925_v63  ;;  %v929_v32 = vsel %vm503_vm4, %v2366_v15, %v2350_v38  ;;  %v947_v1 = vsel %vm541_vm0, %v2371_v2, %v2360_v49 }
 0x299   : > { %v911_v60 = vsel %vm427_vm9, %v905_v34, %v895_v57  ;;  %v2376_v42 = vunpack.i.h.bf16 %v2374_v40  ;;  %v2375_v16 = vunpack.i.l.bf16 %v2374_v40  ;;  %v959_v37 = vpack.c.bf16 %v947_v1, %v929_v32 }
 0x29a   : > { %v953_v3 = vpack.c.bf16 %v911_v60, %v3330_v36  ;;  %2097 = vmatmul.mubr.msk.bf16.vlgmr.msra.gmra.mxu1 %vm979_vm11, %v2726_v7  ;;  %1038 = vmatprep.subr.bf16.mxu1 %v957_v31 }
 0x29b   : > { %v906_v18 = vsel %vm427_vm9, %v2376_v42, %v905_v34  ;;  %v908_v52 = vsel %vm427_vm9, %v2356_v59, %v2375_v16  ;;  %1081 = vmatprep.subr.bf16.mxu0 %v959_v37  ;;  %1039 = vmatpush1.bf16.msra.mxu1 %v956_v23  ;;  %v907_v39 = vsel %vm427_vm9, %v2375_v16, %v2376_v42 }
 0x29c   : > { %v952_v24 = vpack.c.bf16 %v906_v18, %v3328_v30  ;;  %v950_v41 = vpack.c.bf16 %v908_v52, %v3292_v6  ;;  %1082 = vmatpush1.bf16.msra.mxu0 %v958_v55  ;;  %v951_v36 = vpack.c.bf16 %v907_v39, %v3313_v28  ;;  %1058 = vmatprep.mubr.bf16.mxu1 %v2765_v8 }
 0x29d   : > { %1083 = vmatprep.subr.bf16.mxu0 %v953_v3 }
 0x29e   : > { %1040 = vmatprep.subr.bf16.mxu1 %v951_v36 }
 0x29f   : > { %1041 = vmatpush1.bf16.msra.mxu1 %v950_v41 }
 0x2a0   : > { %1084 = vmatpush1.bf16.msra.mxu0 %v952_v24 }
 0x2a2   : > { %2098 = vmatmul.mubr.msk.bf16.vlgmr.msra.gmra.mxu1 %vm979_vm11, %v2726_v7 }
 0x2a3   : > { %2099 = vmatmul.mubr.msk.bf16.vlgmr.msra.gmra.mxu0 %vm979_vm11, %v2726_v7  ;;  %1436 = vmatprep.mubr.bf16.mxu1 %v2765_v8 }
 0x2a4   : > { %1489 = vmatprep.mubr.bf16.mxu0 %v2765_v8 }
 0x2a5   : > { %v967_v30 = vpop.permute.xlu1 %966  ;;  %v972_v28 = vpop.permute.xlu0 %971 }
 0x35a   : > { %v1017_v29 = vpop.f32.mrf.mxu1 }
 0x35b   : > { %v3401_v35 = vadd.f32 %v1017_v29, %v967_v30 }
 0x35c   : > { %v1019_v6 = vpop.f32.mrf.mxu1 }
 0x35d   : > { %v3403_v45 = vadd.f32 %v1019_v6, %v967_v30  ;;  %v1112_v17 = vmax.f32 %v3401_v35, 0.0 }
 0x35e   : > { %v1021_v44 = vpop.f32.mrf.mxu1 }
 0x35f   : > { %v3405_v50 = vadd.f32 %v1021_v44, %v972_v28  ;;  %v1113_v43 = vmax.f32 %v3403_v45, 0.0 }
 0x360   : > { %v1023_v54 = vpop.f32.mrf.mxu1 }
 0x361   : > { %v1118_v46 = vmax.f32 %v3405_v50, 0.0  ;;  %v3409_v47 = vadd.f32 %v1023_v54, %v972_v28 }
 0x362   : > { %v1060_v13 = vpop.f32.mrf.mxu1 }
 0x363   : > { %v1119_v19 = vmax.f32 %v3409_v47, 0.0  ;;  %v1103_v48 = vpop.f32.mrf.mxu0  ;;  %v2378_v49 = vpack.i.bf16 %v1118_v46, %v1112_v17  ;;  %v3417_v51 = vadd.f32 %v1060_v13, %v967_v30 }
 0x364   : > { %v1062_v38 = vpop.f32.mrf.mxu1  ;;  %v3427_v61 = vadd.f32 %v1103_v48, %v967_v30 }
 0x365   : > { %v1105_v53 = vpop.f32.mrf.mxu0  ;;  %2379 = vrot.lane.b32.xlu0 %v2378_v49, %s2766_s23  ;;  %v2388_v21 = vpack.i.bf16 %v1119_v19, %v1113_v43  ;;  %v1114_v12 = vmax.f32 %v3417_v51, 0.0  ;;  %v3436_v58 = vadd.f32 %v1062_v38, %v967_v30 }
 0x366   : > { %v1064_v56 = vpop.f32.mrf.mxu1  ;;  %v1116_v0 = vmax.f32 %v3427_v61, 0.0  ;;  %v1106_v11 = vadd.f32 %v1105_v53, %v967_v30 }
 0x367   : > { %v3424_v57 = vadd.f32 %v1064_v56, %v972_v28  ;;  %v1107_v62 = vpop.f32.mrf.mxu0  ;;  %2389 = vrot.lane.b32.xlu1 %v2388_v21, %s2766_s23  ;;  %v1115_v15 = vmax.f32 %v3436_v58, 0.0 }
 0x368   : > { %v3429_v59 = vadd.f32 %v1107_v62, %v972_v28  ;;  %v1066_v4 = vpop.f32.mrf.mxu1  ;;  %v1117_v27 = vmax.f32 %v1106_v11, 0.0 }
 0x369   : > { %v1120_v5 = vmax.f32 %v3424_v57, 0.0  ;;  %v3433_v22 = vadd.f32 %v1066_v4, %v972_v28  ;;  %2384 = vrot.lane.b32.xlu0 %v2378_v49, %s2761_s15  ;;  %v1109_v33 = vpop.f32.mrf.mxu0 }
 0x36a   : > { %v1122_v10 = vmax.f32 %v3429_v59, 0.0  ;;  %v1110_v20 = vadd.f32 %v1109_v33, %v972_v28 }
 0x36b   : > { %2394 = vrot.lane.b32.xlu1 %v2388_v21, %s2761_s15  ;;  %v2403_v9 = vpack.i.bf16 %v1120_v5, %v1114_v12  ;;  %v1121_v2 = vmax.f32 %v3433_v22, 0.0 }
 0x36c   : > { %v2408_v23 = vpack.i.bf16 %v1122_v10, %v1116_v0  ;;  %v1123_v7 = vmax.f32 %v1110_v20, 0.0 }
 0x36d   : > { %2404 = vrot.lane.b32.xlu0 %v2403_v9, %s2766_s23  ;;  %v2433_v26 = vpack.i.bf16 %v1121_v2, %v1115_v15 }
 0x36e   : > { %v2438_v63 = vpack.i.bf16 %v1123_v7, %v1117_v27 }
 0x36f   : > { %2399 = vrot.lane.b32.xlu1 %v2388_v21, %s2759_s13 }
 0x371   : > { %2409 = vrot.lane.b32.xlu0 %v2408_v23, %s2766_s23 }
 0x373   : > { %2434 = vrot.lane.b32.xlu1 %v2433_v26, %s2766_s23 }
 0x375   : > { %2414 = vrot.lane.b32.xlu0 %v2403_v9, %s2761_s15 }
 0x377   : > { %2439 = vrot.lane.b32.xlu1 %v2438_v63, %s2766_s23  ;;  %s2769_s23 = smov 124  }
 0x379   : > { %2419 = vrot.lane.b32.xlu0 %v2408_v23, %s2761_s15 }
 0x37b   : > { %2444 = vrot.lane.b32.xlu1 %v2433_v26, %s2761_s15 }
 0x37d   : > { %2424 = vrot.lane.b32.xlu0 %v2403_v9, %s2759_s13 }
 0x37f   : > { %2449 = vrot.lane.b32.xlu1 %v2438_v63, %s2761_s15  ;;  %s2768_s15 = smov 20  }
 0x381   : > { %2429 = vrot.lane.b32.xlu0 %v2408_v23, %s2759_s13 }
 0x383   : > { %2454 = vrot.lane.b32.xlu1 %v2433_v26, %s2759_s13 }
 0x385   : > { %2464 = vrot.lane.b32.xlu0 %v2378_v49, %s2759_s13 }
 0x387   : > { %2459 = vrot.lane.b32.xlu1 %v2438_v63, %s2759_s13  ;;  %s2767_s13 = smov 24  }
 0x3d7   : > { %v2380_v25 = vpop.permute.xlu0 %2379 }
 0x3d8   : > { %v2381_v37 = vunpack.i.l.bf16 %v2380_v25  ;;  %v2382_v18 = vunpack.i.h.bf16 %v2380_v25 }
 0x3d9   : > { %v2390_v55 = vpop.permute.xlu1 %2389 }
 0x3da   : > { %v2391_v60 = vunpack.i.l.bf16 %v2390_v55  ;;  %v2392_v42 = vunpack.i.h.bf16 %v2390_v55 }
 0x3db   : > { %v2385_v34 = vpop.permute.xlu0 %2384 }
 0x3dc   : > { %v1156_v39 = vsel %vm427_vm9, %v2381_v37, %v2391_v60  ;;  %v2386_v24 = vunpack.i.l.bf16 %v2385_v34  ;;  %v1157_v36 = vsel %vm427_vm9, %v2382_v18, %v2392_v42  ;;  %v2387_v29 = vunpack.i.h.bf16 %v2385_v34 }
 0x3dd   : > { %v2395_v40 = vpop.permute.xlu1 %2394  ;;  %v3485_v54 = vmax.f32 %v1112_v17, %v1156_v39  ;;  %v3495_v38 = vmax.f32 %v1118_v46, %v1157_v36 }
 0x3de   : > { %v2396_v3 = vunpack.i.l.bf16 %v2395_v40  ;;  %v2397_v41 = vunpack.i.h.bf16 %v2395_v40 }
 0x3df   : > { %v2405_v31 = vpop.permute.xlu0 %2404 }
 0x3e0   : > { %v3481_v6 = vsel %vm503_vm4, %v2386_v24, %v2396_v3  ;;  %v2407_v28 = vunpack.i.h.bf16 %v2405_v31  ;;  %v2406_v44 = vunpack.i.l.bf16 %v2405_v31  ;;  %v3491_v48 = vsel %vm503_vm4, %v2387_v29, %v2397_v41 }
 0x3e1   : > { %v3469_v32 = vpop.permute.xlu1 %2399  ;;  %v1202_v53 = vmax.f32 %v3485_v54, %v3481_v6  ;;  %v1207_v4 = vmax.f32 %v3495_v38, %v3491_v48 }
 0x3e2   : > { %v1155_v35 = vsel %vm427_vm9, %v2392_v42, %v2407_v28  ;;  %v1154_v17 = vsel %vm427_vm9, %v2391_v60, %v2406_v44  ;;  %v2402_v63 = vunpack.i.h.bf16 %v3469_v32  ;;  %v2401_v25 = vunpack.i.l.bf16 %v3469_v32 }
 0x3e3   : > { %v3471_v1 = vpop.permute.xlu0 %2409  ;;  %v1164_v26 = vmax.f32 %v1119_v19, %v1155_v35  ;;  %v1159_v27 = vmax.f32 %v1113_v43, %v1154_v17 }
 0x3e4   : > { %v2411_v56 = vunpack.i.l.bf16 %v3471_v1  ;;  %v2412_v50 = vunpack.i.h.bf16 %v3471_v1 }
 0x3e5   : > { %v2435_v16 = vpop.permute.xlu1 %2434 }
 0x3e6   : > { %v2436_v49 = vunpack.i.l.bf16 %v2435_v16  ;;  %v2437_v62 = vunpack.i.h.bf16 %v2435_v16 }
 0x3e7   : > { %v2415_v52 = vpop.permute.xlu0 %2414 }
 0x3e8   : > { %v2417_v46 = vunpack.i.h.bf16 %v2415_v52  ;;  %v2416_v33 = vunpack.i.l.bf16 %v2415_v52  ;;  %v1150_v20 = vsel %vm427_vm9, %v2436_v49, %v2411_v56  ;;  %v1152_v11 = vsel %vm427_vm9, %v2406_v44, %v2436_v49 }
 0x3e9   : > { %v3477_v30 = vpop.permute.xlu1 %2439  ;;  %v1151_v34 = vsel %vm427_vm9, %v2437_v62, %v2412_v50  ;;  %v1153_v40 = vsel %vm427_vm9, %v2407_v28, %v2437_v62  ;;  %v1160_v45 = vmax.f32 %v1114_v12, %v1152_v11  ;;  %v1161_v43 = vmax.f32 %v1115_v15, %v1150_v20 }
 0x3ea   : > { %v1199_v31 = vsel %vm503_vm4, %v2397_v41, %v2417_v46  ;;  %v1198_v32 = vsel %vm503_vm4, %v2396_v3, %v2416_v33  ;;  %v1165_v15 = vmax.f32 %v1120_v5, %v1153_v40  ;;  %v1166_v16 = vmax.f32 %v1121_v2, %v1151_v34 }
 0x3eb   : > { %v3487_v13 = vpop.permute.xlu0 %2419  ;;  %v1203_v36 = vmax.f32 %v1159_v27, %v1198_v32  ;;  %v1208_v29 = vmax.f32 %v1164_v26, %v1199_v31  ;;  %v2441_v20 = vunpack.i.l.bf16 %v3477_v30 }
 0x3ec   : > { %v2422_v47 = vunpack.i.h.bf16 %v3487_v13  ;;  %v2421_v19 = vunpack.i.l.bf16 %v3487_v13 }
 0x3ed   : > { %v2445_v21 = vpop.permute.xlu1 %2444 }
 0x3ee   : > { %v2447_v23 = vunpack.i.h.bf16 %v2445_v21  ;;  %v2446_v7 = vunpack.i.l.bf16 %v2445_v21 }
 0x3ef   : > { %v2425_v9 = vpop.permute.xlu0 %2424 }
 0x3f0   : > { %v1194_v42 = vsel %vm503_vm4, %v2446_v7, %v2421_v19  ;;  %v1195_v51 = vsel %vm503_vm4, %v2447_v23, %v2422_v47  ;;  %v2427_v12 = vunpack.i.h.bf16 %v2425_v9  ;;  %v2426_v58 = vunpack.i.l.bf16 %v2425_v9 }
 0x3f1   : > { %v3519_v55 = vpop.permute.xlu1 %2449  ;;  %v1196_v37 = vsel %vm503_vm4, %v2416_v33, %v2446_v7  ;;  %v1197_v3 = vsel %vm503_vm4, %v2417_v46, %v2447_v23  ;;  %v1205_v57 = vmax.f32 %v1161_v43, %v1194_v42  ;;  %v1210_v5 = vmax.f32 %v1166_v16, %v1195_v51  ;;  %v1363_v16 = vld [vmem:[%s4159_s6] sm:$0xff] }
 0x3f2   : > { %v1243_v22 = vsel %vm541_vm0, %v2402_v63, %v2427_v12  ;;  %v1242_v2 = vsel %vm541_vm0, %v2401_v25, %v2426_v58  ;;  %v1204_v49 = vmax.f32 %v1160_v45, %v1196_v37  ;;  %v1209_v38 = vmax.f32 %v1165_v15, %v1197_v3  ;;  %v1365_v15 = vld [vmem:[%s4159_s6 + $0x10] sm:$0xff]  ;;  %v1366_v37 = vld [vmem:[%s4159_s6 + $0x18] sm:$0xff]  ;;  %v1364_v3 = vld [vmem:[%s4159_s6 + $0x8] sm:$0xff] }
 0x3f3   : > { %v3537_v60 = vpop.permute.xlu0 %2429  ;;  %v2442_v9 = vunpack.i.h.bf16 %v3477_v30  ;;  %v3575_v11 = vmax.f32 %v1203_v36, %v1242_v2  ;;  %v3577_v23 = vmax.f32 %v1208_v29, %v1243_v22  ;;  %v2452_v43 = vunpack.i.h.bf16 %v3519_v55 }
 0x3f4   : > { %v2432_v52 = vunpack.i.h.bf16 %v3537_v60  ;;  %v2431_v39 = vunpack.i.l.bf16 %v3537_v60  ;;  %v2451_v31 = vunpack.i.l.bf16 %v3519_v55 }
 0x3f5   : > { %v2455_v18 = vpop.permute.xlu1 %2454  ;;  %v1149_v6 = vsel %vm427_vm9, %v2412_v50, %v2442_v9  ;;  %v1193_v50 = vsel %vm503_vm4, %v2422_v47, %v2452_v43  ;;  %v2483_v51 = vpack.i.bf16 %v3577_v23, %v3575_v11 }
 0x3f6   : > { %v2457_v24 = vunpack.i.h.bf16 %v2455_v18  ;;  %v2456_v41 = vunpack.i.l.bf16 %v2455_v18  ;;  %v1167_v42 = vmax.f32 %v1122_v10, %v1149_v6 }
 0x3f7   : > { %v2465_v28 = vpop.permute.xlu0 %2464 }
 0x3f8   : > { %v1238_v44 = vsel %vm541_vm0, %v2456_v41, %v2431_v39  ;;  %v1239_v48 = vsel %vm541_vm0, %v2457_v24, %v2432_v52  ;;  %v1240_v21 = vsel %vm541_vm0, %v2426_v58, %v2456_v41  ;;  %v1241_v35 = vsel %vm541_vm0, %v2427_v12, %v2457_v24 }
 0x3f9   : > { %v3569_v17 = vmax.f32 %v1205_v57, %v1238_v44  ;;  %v3571_v62 = vmax.f32 %v1210_v5, %v1239_v48  ;;  %v2467_v46 = vunpack.i.h.bf16 %v2465_v28  ;;  %v2466_v33 = vunpack.i.l.bf16 %v2465_v28  ;;  %v2460_v45 = vpop.permute.xlu1 %2459 }
 0x3fa   : > { %v3579_v7 = vmax.f32 %v1204_v49, %v1240_v21  ;;  %v3581_v26 = vmax.f32 %v1209_v38, %v1241_v35  ;;  %v1211_v13 = vmax.f32 %v1167_v42, %v1193_v50 }
 0x3fb   : > { %v1245_v27 = vsel %vm541_vm0, %v2467_v46, %v2402_v63  ;;  %v1244_v34 = vsel %vm541_vm0, %v2466_v33, %v2401_v25  ;;  %v1346_v32 = vpack.c.bf16 %v3571_v62, %v3569_v17  ;;  %v1148_v63 = vsel %vm427_vm9, %v2411_v56, %v2441_v20 }
 0x3fc   : > { %v3590_v40 = vmax.f32 %v1202_v53, %v1244_v34  ;;  %v3592_v30 = vmax.f32 %v1207_v4, %v1245_v27  ;;  %v2462_v53 = vunpack.i.h.bf16 %v2460_v45  ;;  %v2461_v4 = vunpack.i.l.bf16 %v2460_v45 }
 0x3fd   : > { %v1344_v25 = vpack.c.bf16 %v3577_v23, %v3575_v11  ;;  %v1345_v55 = vpack.c.bf16 %v3581_v26, %v3579_v7  ;;  %v1192_v56 = vsel %vm503_vm4, %v2421_v19, %v2451_v31  ;;  %v1162_v60 = vmax.f32 %v1116_v0, %v1148_v63 }
 0x3fe   : > { %v2473_v54 = vpack.i.bf16 %v3592_v30, %v3590_v40  ;;  %v1343_v1 = vpack.c.bf16 %v3592_v30, %v3590_v40  ;;  %v1236_v12 = vsel %vm541_vm0, %v2431_v39, %v2461_v4  ;;  %v1237_v19 = vsel %vm541_vm0, %v2432_v52, %v2462_v53 }
 0x3ff   : > { %v1206_v58 = vmax.f32 %v1162_v60, %v1192_v56  ;;  %v1255_v0 = vmax.f32 %v1211_v13, %v1237_v19  ;;  %v2493_v59 = vpack.i.bf16 %v3581_v26, %v3579_v7  ;;  %v2498_v47 = vpack.i.bf16 %v3571_v62, %v3569_v17  ;;  %v2728_v17 = vld [vmem:[%s4158_s5 + $0x8] sm:$0xff]  }
 0x400   : > { %2474 = vrot.lane.b32.xlu0 %v2473_v54, %s2767_s13  ;;  %2469 = vrot.lane.b32.xlu1 %v2473_v54, %s2768_s15  ;;  %vm1752_vm0 = vcmp.lt.s32.totalorder %v2957_v14, 40  ;;  %v2731_v14 = vld [vmem:[%s4160_s7 + $0x10] sm:$0xff]  }
 0x401   : > { %v1250_v61 = vmax.f32 %v1206_v58, %v1236_v12 }
 0x403   : > { %v2503_v10 = vpack.i.bf16 %v1255_v0, %v1250_v61 }
 0x404   : > { %2484 = vrot.lane.b32.xlu0 %v2483_v51, %s2767_s13  ;;  %2479 = vrot.lane.b32.xlu1 %v2483_v51, %s2768_s15 }
 0x408   : > { %2494 = vrot.lane.b32.xlu0 %v2493_v59, %s2768_s15  ;;  %2489 = vrot.lane.b32.xlu1 %v2483_v51, %s2769_s23 }
 0x40c   : > { %2504 = vrot.lane.b32.xlu0 %v2503_v10, %s2768_s15  ;;  %2499 = vrot.lane.b32.xlu1 %v2498_v47, %s2768_s15 }
 0x410   : > { %2514 = vrot.lane.b32.xlu0 %v2498_v47, %s2767_s13  ;;  %2509 = vrot.lane.b32.xlu1 %v2493_v59, %s2767_s13 }
 0x414   : > { %2524 = vrot.lane.b32.xlu0 %v2493_v59, %s2769_s23  ;;  %2519 = vrot.lane.b32.xlu1 %v2503_v10, %s2767_s13 }
 0x418   : > { %2534 = vrot.lane.b32.xlu0 %v2503_v10, %s2769_s23  ;;  %2529 = vrot.lane.b32.xlu1 %v2498_v47, %s2769_s23 }
 0x41c   : > { %1379 = vperm.xlu0 %2291, %v1365_v15   ;;  %2539 = vrot.lane.b32.xlu1 %v2473_v54, %s2769_s23 }
 0x420   : > { %1369 = vperm.xlu0 %2291, %v1363_v16   ;;  %1384 = vperm.xlu1 %2377, %v1366_v37  }
 0x424   : > { %1374 = vperm.xlu1 %2377, %v1364_v3  }
 0x472   : > { %v2475_v18 = vpop.permute.xlu0 %2474  ;;  %v2470_v52 = vpop.permute.xlu1 %2469 }
 0x473   : > { %v2472_v29 = vunpack.i.h.bf16 %v2470_v52  ;;  %v2471_v57 = vunpack.i.l.bf16 %v2470_v52  ;;  %v2477_v31 = vunpack.i.h.bf16 %v2475_v18  ;;  %v2476_v63 = vunpack.i.l.bf16 %v2475_v18 }
 0x476   : > { %v2485_v39 = vpop.permute.xlu0 %2484  ;;  %v2480_v24 = vpop.permute.xlu1 %2479 }
 0x477   : > { %v2482_v41 = vunpack.i.h.bf16 %v2480_v24  ;;  %v2481_v36 = vunpack.i.l.bf16 %v2480_v24  ;;  %v2487_v21 = vunpack.i.h.bf16 %v2485_v39  ;;  %v2486_v35 = vunpack.i.l.bf16 %v2485_v39 }
 0x479   : > { %v1341_v22 = vsel %vm1334_vm12, %v2471_v57, %v2481_v36  ;;  %v1342_v2 = vsel %vm1334_vm12, %v2472_v29, %v2482_v41  ;;  %v1312_v56 = vsel %vm1305_vm13, %v2476_v63, %v2486_v35  ;;  %v1313_v50 = vsel %vm1305_vm13, %v2477_v31, %v2487_v21 }
 0x47a   : > { %v2495_v5 = vpop.permute.xlu0 %2494  ;;  %v3664_v28 = vpop.permute.xlu1 %2489  ;;  %v1355_v46 = vpack.c.bf16 %v1342_v2, %v1341_v22  ;;  %v1351_v0 = vpack.c.bf16 %v1313_v50, %v1312_v56 }
 0x47b   : > { %v2497_v44 = vunpack.i.h.bf16 %v2495_v5  ;;  %v2496_v48 = vunpack.i.l.bf16 %v2495_v5  ;;  %v2492_v59 = vunpack.i.h.bf16 %v3664_v28  ;;  %v2491_v15 = vunpack.i.l.bf16 %v3664_v28 }
 0x47d   : > { %v1339_v49 = vsel %vm1334_vm12, %v2481_v36, %v2496_v48  ;;  %v1340_v38 = vsel %vm1334_vm12, %v2482_v41, %v2497_v44 }
 0x47e   : > { %v2505_v33 = vpop.permute.xlu0 %2504  ;;  %v2500_v9 = vpop.permute.xlu1 %2499  ;;  %v1356_v20 = vpack.c.bf16 %v1340_v38, %v1339_v49 }
 0x47f   : > { %v2507_v27 = vunpack.i.h.bf16 %v2505_v33  ;;  %v2506_v34 = vunpack.i.l.bf16 %v2505_v33  ;;  %v2502_v45 = vunpack.i.h.bf16 %v2500_v9  ;;  %v2501_v43 = vunpack.i.l.bf16 %v2500_v9 }
 0x480   : > { %1412 = vmatprep.subr.bf16.mxu1 %v1356_v20 }
 0x481   : > { %v1338_v6 = vsel %vm1334_vm12, %v2497_v44, %v2502_v45  ;;  %v1337_v54 = vsel %vm1334_vm12, %v2496_v48, %v2501_v43  ;;  %1413 = vmatpush1.bf16.msra.mxu1 %v1355_v46  ;;  %v1335_v53 = vsel %vm1334_vm12, %v2501_v43, %v2506_v34  ;;  %v1336_v4 = vsel %vm1334_vm12, %v2502_v45, %v2507_v27 }
 0x482   : > { %v1357_v60 = vpack.c.bf16 %v1338_v6, %v1337_v54  ;;  %v2515_v42 = vpop.permute.xlu0 %2514  ;;  %v2510_v51 = vpop.permute.xlu1 %2509  ;;  %v1358_v12 = vpack.c.bf16 %v1336_v4, %v1335_v53  ;;  %v2727_v4 = vld [vmem:[%s4158_s5] sm:$0xff]  }
 0x483   : > { %v2517_v19 = vunpack.i.h.bf16 %v2515_v42  ;;  %v2516_v58 = vunpack.i.l.bf16 %v2515_v42  ;;  %v2512_v13 = vunpack.i.h.bf16 %v2510_v51  ;;  %v2511_v61 = vunpack.i.l.bf16 %v2510_v51 }
 0x484   : > { %1465 = vmatprep.subr.bf16.mxu0 %v1358_v12 }
 0x485   : > { %1466 = vmatpush1.bf16.msra.mxu0 %v1357_v60  ;;  %v1310_v10 = vsel %vm1305_vm13, %v2486_v35, %v2511_v61  ;;  %v1311_v47 = vsel %vm1305_vm13, %v2487_v21, %v2512_v13  ;;  %v1309_v16 = vsel %vm1305_vm13, %v2512_v13, %v2517_v19  ;;  %v1308_v37 = vsel %vm1305_vm13, %v2511_v61, %v2516_v58 }
 0x486   : > { %v2525_v3 = vpop.permute.xlu0 %2524  ;;  %v2520_v18 = vpop.permute.xlu1 %2519  ;;  %v1352_v52 = vpack.c.bf16 %v1311_v47, %v1310_v10  ;;  %v1353_v22 = vpack.c.bf16 %v1309_v16, %v1308_v37 }
 0x487   : > { %v2527_v39 = vunpack.i.h.bf16 %v2525_v3  ;;  %v2526_v24 = vunpack.i.l.bf16 %v2525_v3  ;;  %v2522_v41 = vunpack.i.h.bf16 %v2520_v18  ;;  %v2521_v36 = vunpack.i.l.bf16 %v2520_v18 }
 0x488   : > { %1414 = vmatprep.subr.bf16.mxu1 %v1352_v52 }
 0x489   : > { %1415 = vmatpush1.bf16.msra.mxu1 %v1351_v0  ;;  %v1281_v29 = vsel %vm1276_vm14, %v2491_v15, %v2526_v24  ;;  %v1282_v57 = vsel %vm1276_vm14, %v2492_v59, %v2527_v39  ;;  %v1306_v5 = vsel %vm1305_vm13, %v2516_v58, %v2521_v36  ;;  %v1307_v28 = vsel %vm1305_vm13, %v2517_v19, %v2522_v41 }
 0x48a   : > { %v2535_v2 = vpop.permute.xlu0 %2534  ;;  %v2530_v44 = vpop.permute.xlu1 %2529  ;;  %v1348_v48 = vpack.c.bf16 %v1282_v57, %v1281_v29  ;;  %v1354_v49 = vpack.c.bf16 %v1307_v28, %v1306_v5 }
 0x48b   : > { %v2537_v38 = vunpack.i.h.bf16 %v2535_v2  ;;  %v2536_v21 = vunpack.i.l.bf16 %v2535_v2  ;;  %v2532_v35 = vunpack.i.h.bf16 %v2530_v44  ;;  %v2531_v46 = vunpack.i.l.bf16 %v2530_v44 }
 0x48c   : > { %1416 = vmatprep.subr.bf16.mxu1 %v1348_v48  ;;  %1467 = vmatprep.subr.bf16.mxu0 %v1354_v49 }
 0x48d   : > { %v1280_v33 = vsel %vm1276_vm14, %v2527_v39, %v2532_v35  ;;  %v1279_v9 = vsel %vm1276_vm14, %v2526_v24, %v2531_v46  ;;  %1468 = vmatpush1.bf16.msra.mxu0 %v1353_v22  ;;  %v1277_v20 = vsel %vm1276_vm14, %v2531_v46, %v2536_v21  ;;  %v1278_v27 = vsel %vm1276_vm14, %v2532_v35, %v2537_v38 }
 0x48e   : > { %v1349_v34 = vpack.c.bf16 %v1280_v33, %v1279_v9  ;;  %v2540_v45 = vpop.permute.xlu1 %2539  ;;  %v1350_v43 = vpack.c.bf16 %v1278_v27, %v1277_v20 }
 0x48f   : > { %v2542_v31 = vunpack.i.h.bf16 %v2540_v45  ;;  %v2541_v63 = vunpack.i.l.bf16 %v2540_v45 }
 0x490   : > { %1469 = vmatprep.subr.bf16.mxu0 %v1350_v43 }
 0x491   : > { %v1283_v6 = vsel %vm1276_vm14, %v2541_v63, %v2491_v15  ;;  %v1284_v54 = vsel %vm1276_vm14, %v2542_v31, %v2492_v59  ;;  %1470 = vmatpush1.bf16.msra.mxu0 %v1349_v34 }
 0x492   : > { %v1347_v53 = vpack.c.bf16 %v1284_v54, %v1283_v6  ;;  %1471 = vmatprep.subr.bf16.mxu0 %v1346_v32 }
 0x494   : > { %1417 = vmatpush1.bf16.msra.mxu1 %v1347_v53 }
 0x495   : > { %1418 = vmatprep.subr.bf16.mxu1 %v1344_v25  ;;  %1472 = vmatpush1.bf16.msra.mxu0 %v1345_v55 }
 0x497   : > { %v3742_v62 = vpop.permute.xlu0 %1379 }
 0x498   : > { %1419 = vmatpush1.bf16.msra.mxu1 %v1343_v1  ;;  %2104 = vmatmul.mubr.msk.bf16.vlgmr.msra.gmra.mxu0 %vm1397_vm15, %v2727_v4 }
 0x499   : > { %1499 = vmatprep.mubr.bf16.mxu0 %v2765_v8 }
 0x49b   : > { %2102 = vmatmul.mubr.msk.bf16.vlgmr.msra.gmra.mxu1 %vm1397_vm15, %v2727_v4  ;;  %v1385_v11 = vpop.permute.xlu1 %1384  ;;  %v3744_v7 = vpop.permute.xlu0 %1369 }
 0x49c   : > { %1446 = vmatprep.mubr.bf16.mxu1 %v2765_v8 }
 0x49f   : > { %v3751_v32 = vpop.permute.xlu1 %1374 }
 0x4a0   : > { %2105 = vmatmul.mubr.msk.bf16.gmra.mxu0 %vm1397_vm15, %v2728_v17 }
 0x4a3   : > { %2103 = vmatmul.mubr.msk.bf16.gmra.mxu1 %vm1397_vm15, %v2728_v17 }
 0x558   : > { %v1491_v23 = vpop.f32.mrf.mxu0 }
 0x559   : > { %v3747_v40 = vadd.f32 %v1491_v23, %v3744_v7 }
 0x55a   : > { %v1493_v26 = vpop.f32.mrf.mxu0 }
 0x55b   : > { %v3749_v30 = vpop.f32.mrf.mxu1  ;;  %v1512_v56 = vmax.f32 %v3747_v40, 0.0  ;;  %v1494_v10 = vadd.f32 %v1493_v26, %v3744_v7 }
 0x55c   : > { %v1495_v25 = vpop.f32.mrf.mxu0  ;;  %v3832_v31 = vadd.f32 %v3749_v30, %v3744_v7 }
 0x55d   : > { %v3754_v8 = vadd.f32 %v1495_v25, %v3751_v32  ;;  %v1440_v55 = vpop.f32.mrf.mxu1  ;;  %v1513_v36 = vmax.f32 %v1494_v10, 0.0 }
 0x55e   : > { %v1497_v1 = vpop.f32.mrf.mxu0  ;;  %v3759_v42 = vadd.f32 %v1440_v55, %v3744_v7  ;;  %v4167_v6 = vmax.f32 %v3832_v31, 0.0 }
 0x55f   : > { %v1516_v50 = vmax.f32 %v3754_v8, 0.0  ;;  %v1442_v60 = vpop.f32.mrf.mxu1  ;;  %v1498_v58 = vadd.f32 %v1497_v1, %v3751_v32 }
 0x560   : > { %v1501_v51 = vpop.f32.mrf.mxu0  ;;  %v1511_v47 = vmax.f32 %v3759_v42, 0.0  ;;  %v3824_v45 = vadd.f32 %v1442_v60, %v3751_v32 }
 0x561   : > { %v1444_v12 = vpop.f32.mrf.mxu1  ;;  %v2543_v19 = vpack.i.bf16 %v1516_v50, %v1512_v56  ;;  %v3770_v0 = vadd.f32 %v1501_v51, %v3742_v62  ;;  %v1517_v18 = vmax.f32 %v1498_v58, 0.0 }
 0x562   : > { %v3767_v13 = vadd.f32 %v1444_v12, %v3751_v32  ;;  %v1503_v61 = vpop.f32.mrf.mxu0  ;;  %v4168_v63 = vmax.f32 %v3824_v45, 0.0 }
 0x563   : > { %2544 = vrot.lane.b32.xlu1 %v2543_v19, %s2769_s23  ;;  %v1448_v59 = vpop.f32.mrf.mxu1  ;;  %v1520_v39 = vmax.f32 %v3770_v0, 0.0  ;;  %v2558_v22 = vpack.i.bf16 %v1517_v18, %v1513_v36  ;;  %v1504_v49 = vadd.f32 %v1503_v61, %v3742_v62 }
 0x564   : > { %v1515_v15 = vmax.f32 %v3767_v13, 0.0  ;;  %v1505_v16 = vpop.f32.mrf.mxu0  ;;  %v3815_v20 = vadd.f32 %v1448_v59, %v3742_v62  ;;  %v2658_v54 = vpack.i.bf16 %v4168_v63, %v4167_v6 }
 0x565   : > { %v3776_v37 = vadd.f32 %v1505_v16, %v1385_v11  ;;  %v1450_v3 = vpop.f32.mrf.mxu1  ;;  %v1521_v46 = vmax.f32 %v1504_v49, 0.0 }
 0x566   : > { %v2553_v52 = vpack.i.bf16 %v1515_v15, %v1511_v47  ;;  %v1507_v5 = vpop.f32.mrf.mxu0  ;;  %v3793_v2 = vadd.f32 %v1450_v3, %v3742_v62  ;;  %v1518_v34 = vmax.f32 %v3815_v20, 0.0 }
 0x567   : > { %v1524_v24 = vmax.f32 %v3776_v37, 0.0  ;;  %2549 = vrot.lane.b32.xlu1 %v2543_v19, %s2767_s13  ;;  %v1452_v41 = vpop.f32.mrf.mxu1  ;;  %v1508_v44 = vadd.f32 %v1507_v5, %v1385_v11 }
 0x568   : > { %2554 = vrot.lane.b32.xlu0 %v2553_v52, %s2769_s23  ;;  %v1519_v38 = vmax.f32 %v3793_v2, 0.0  ;;  %v3812_v9 = vadd.f32 %v1452_v41, %v1385_v11 }
 0x569   : > { %v1454_v29 = vpop.f32.mrf.mxu1  ;;  %v2568_v57 = vpack.i.bf16 %v1524_v24, %v1520_v39  ;;  %v1525_v21 = vmax.f32 %v1508_v44, 0.0 }
 0x56a   : > { %v3790_v28 = vadd.f32 %v1454_v29, %v1385_v11  ;;  %v1522_v27 = vmax.f32 %v3812_v9, 0.0 }
 0x56b   : > { %2569 = vrot.lane.b32.xlu1 %v2568_v57, %s2769_s23  ;;  %v2613_v33 = vpack.i.bf16 %v1525_v21, %v1521_v46 }
 0x56c   : > { %2559 = vrot.lane.b32.xlu0 %v2558_v22, %s2769_s23  ;;  %v1523_v48 = vmax.f32 %v3790_v28, 0.0  ;;  %v2638_v43 = vpack.i.bf16 %v1522_v27, %v1518_v34 }
 0x56e   : > { %v2608_v35 = vpack.i.bf16 %v1523_v48, %v1519_v38 }
 0x56f   : > { %2599 = vrot.lane.b32.xlu1 %v2553_v52, %s2768_s15 }
 0x570   : > { %2564 = vrot.lane.b32.xlu0 %v2553_v52, %s2767_s13 }
 0x573   : > { %2609 = vrot.lane.b32.xlu1 %v2608_v35, %s2767_s13 }
 0x574   : > { %2574 = vrot.lane.b32.xlu0 %v2568_v57, %s2767_s13 }
 0x577   : > { %2614 = vrot.lane.b32.xlu1 %v2613_v33, %s2767_s13 }
 0x578   : > { %2579 = vrot.lane.b32.xlu0 %v2568_v57, %s2768_s15 }
 0x57b   : > { %2619 = vrot.lane.b32.xlu1 %v2608_v35, %s2768_s15 }
 0x57c   : > { %2584 = vrot.lane.b32.xlu0 %v2608_v35, %s2769_s23 }
 0x57f   : > { %2624 = vrot.lane.b32.xlu1 %v2613_v33, %s2768_s15 }
 0x580   : > { %2589 = vrot.lane.b32.xlu0 %v2613_v33, %s2769_s23 }
 0x583   : > { %2629 = vrot.lane.b32.xlu1 %v2558_v22, %s2768_s15 }
 0x584   : > { %2594 = vrot.lane.b32.xlu0 %v2558_v22, %s2767_s13 }
 0x587   : > { %2639 = vrot.lane.b32.xlu1 %v2638_v43, %s2767_s13 }
 0x588   : > { %2604 = vrot.lane.b32.xlu0 %v2543_v19, %s2768_s15 }
 0x58b   : > { %2649 = vrot.lane.b32.xlu1 %v2638_v43, %s2768_s15 }
 0x58c   : > { %2634 = vrot.lane.b32.xlu0 %v2638_v43, %s2769_s23 }
 0x58f   : > { %2659 = vrot.lane.b32.xlu1 %v2658_v54, %s2768_s15  ;;  %s2771_s15 = smov 48  }
 0x590   : > { %2644 = vrot.lane.b32.xlu0 %v2658_v54, %s2769_s23  ;;  %s2772_s23 = smov 120  }
 0x594   : > { %2654 = vrot.lane.b32.xlu0 %v2658_v54, %s2767_s13  ;;  %s2770_s13 = smov 40  }
 0x5d5   : > { %v2545_v53 = vpop.permute.xlu1 %2544 }
 0x5d6   : > { %v2547_v1 = vunpack.i.h.bf16 %v2545_v53  ;;  %v2546_v60 = vunpack.i.l.bf16 %v2545_v53 }
 0x5d9   : > { %v3847_v4 = vpop.permute.xlu1 %2549 }
 0x5da   : > { %v3849_v17 = vpop.permute.xlu0 %2554  ;;  %v2552_v19 = vunpack.i.h.bf16 %v3847_v4  ;;  %v2551_v10 = vunpack.i.l.bf16 %v3847_v4 }
 0x5db   : > { %v2557_v32 = vunpack.i.h.bf16 %v3849_v17  ;;  %v2556_v25 = vunpack.i.l.bf16 %v3849_v17 }
 0x5dd   : > { %v2570_v62 = vpop.permute.xlu1 %2569  ;;  %v1563_v58 = vsel %vm1276_vm14, %v2557_v32, %v2547_v1  ;;  %v1562_v61 = vsel %vm1276_vm14, %v2556_v25, %v2546_v60 }
 0x5de   : > { %v2560_v11 = vpop.permute.xlu0 %2559  ;;  %v3885_v5 = vmax.f32 %v1515_v15, %v1563_v58  ;;  %v3889_v22 = vmax.f32 %v1511_v47, %v1562_v61  ;;  %v2572_v44 = vunpack.i.h.bf16 %v2570_v62  ;;  %v2571_v49 = vunpack.i.l.bf16 %v2570_v62 }
 0x5df   : > { %v2562_v55 = vunpack.i.h.bf16 %v2560_v11  ;;  %v2561_v59 = vunpack.i.l.bf16 %v2560_v11 }
 0x5e1   : > { %v3851_v23 = vpop.permute.xlu1 %2599  ;;  %v1559_v16 = vsel %vm1276_vm14, %v2547_v1, %v2562_v55  ;;  %v1558_v46 = vsel %vm1276_vm14, %v2546_v60, %v2561_v59 }
 0x5e2   : > { %v3853_v7 = vpop.permute.xlu0 %2564  ;;  %v3895_v35 = vmax.f32 %v1516_v50, %v1559_v16  ;;  %v2602_v37 = vunpack.i.h.bf16 %v3851_v23  ;;  %v2601_v0 = vunpack.i.l.bf16 %v3851_v23  ;;  %v1780_v23 = vld [vmem:[%s4161_s8 + $0x38] sm:$0xff] }
 0x5e3   : > { %v4166_v3 = vunpack.i.h.bf16 %v3853_v7  ;;  %v4165_v18 = vunpack.i.l.bf16 %v3853_v7 }
 0x5e5   : > { %v3855_v26 = vpop.permute.xlu1 %2609  ;;  %v3907_v42 = vsel %vm1305_vm13, %v4166_v3, %v2552_v19  ;;  %v3913_v8 = vsel %vm1305_vm13, %v4165_v18, %v2551_v10 }
 0x5e6   : > { %v3857_v30 = vpop.permute.xlu0 %2574  ;;  %v2612_v52 = vunpack.i.h.bf16 %v3855_v26  ;;  %v2611_v41 = vunpack.i.l.bf16 %v3855_v26  ;;  %v1627_v40 = vmax.f32 %v3889_v22, %v3913_v8 }
 0x5e7   : > { %v2577_v36 = vunpack.i.h.bf16 %v3857_v30  ;;  %v2576_v29 = vunpack.i.l.bf16 %v3857_v30 }
 0x5e9   : > { %v2615_v51 = vpop.permute.xlu1 %2614  ;;  %v1621_v15 = vsel %vm1305_vm13, %v2612_v52, %v2577_v36  ;;  %v1620_v43 = vsel %vm1305_vm13, %v2611_v41, %v2576_v29 }
 0x5ea   : > { %v3861_v12 = vpop.permute.xlu0 %2579  ;;  %v2617_v58 = vunpack.i.h.bf16 %v2615_v51  ;;  %v2616_v61 = vunpack.i.l.bf16 %v2615_v51 }
 0x5eb   : > { %v2582_v11 = vunpack.i.h.bf16 %v3861_v12  ;;  %v2581_v30 = vunpack.i.l.bf16 %v3861_v12 }
 0x5ed   : > { %v3881_v57 = vpop.permute.xlu1 %2619 }
 0x5ee   : > { %v3891_v21 = vpop.permute.xlu0 %2584  ;;  %v4169_v50 = vunpack.i.h.bf16 %v3881_v57  ;;  %v2621_v47 = vunpack.i.l.bf16 %v3881_v57 }
 0x5ef   : > { %v2587_v33 = vunpack.i.h.bf16 %v3891_v21  ;;  %v2586_v13 = vunpack.i.l.bf16 %v3891_v21 }
 0x5f0   : > { %v1676_v18 = vsel %vm1334_vm12, %v2621_v47, %v2581_v30  ;;  %v1677_v12 = vsel %vm1334_vm12, %v4169_v50, %v2582_v11 }
 0x5f1   : > { %v1565_v54 = vsel %vm1276_vm14, %v2587_v33, %v2572_v44  ;;  %v1564_v53 = vsel %vm1276_vm14, %v2586_v13, %v2571_v49  ;;  %v2625_v62 = vpop.permute.xlu1 %2624 }
 0x5f2   : > { %v1580_v55 = vmax.f32 %v1523_v48, %v1565_v54  ;;  %v1577_v1 = vmax.f32 %v1519_v38, %v1564_v53  ;;  %v2590_v60 = vpop.permute.xlu0 %2589  ;;  %v2627_v54 = vunpack.i.h.bf16 %v2625_v62  ;;  %v2626_v2 = vunpack.i.l.bf16 %v2625_v62 }
 0x5f3   : > { %v2592_v59 = vunpack.i.h.bf16 %v2590_v60  ;;  %v2591_v16 = vunpack.i.l.bf16 %v2590_v60 }
 0x5f4   : > { %v1633_v28 = vmax.f32 %v1577_v1, %v1620_v43  ;;  %v1636_v48 = vmax.f32 %v1580_v55, %v1621_v15  ;;  %v1616_v15 = vsel %vm1305_vm13, %v2576_v29, %v2616_v61  ;;  %v1617_v43 = vsel %vm1305_vm13, %v2577_v36, %v2617_v58 }
 0x5f5   : > { %v1561_v38 = vsel %vm1276_vm14, %v2572_v44, %v2592_v59  ;;  %v1560_v51 = vsel %vm1276_vm14, %v2571_v49, %v2591_v16  ;;  %v2630_v53 = vpop.permute.xlu1 %2629  ;;  %v1572_v49 = vmax.f32 %v1512_v56, %v1558_v46  ;;  %v1630_v56 = vmax.f32 %v3885_v5, %v3907_v42 }
 0x5f6   : > { %v1689_v60 = vmax.f32 %v1633_v28, %v1676_v18  ;;  %v1692_v3 = vmax.f32 %v1636_v48, %v1677_v12  ;;  %v1581_v6 = vmax.f32 %v1524_v24, %v1561_v38  ;;  %v1578_v63 = vmax.f32 %v1520_v39, %v1560_v51  ;;  %v2595_v50 = vpop.permute.xlu0 %2594 }
 0x5f7   : > { %v2597_v44 = vunpack.i.h.bf16 %v2595_v50  ;;  %v2596_v62 = vunpack.i.l.bf16 %v2595_v50 }
 0x5f8   : > { %v1634_v18 = vmax.f32 %v1578_v63, %v1616_v15  ;;  %v1637_v55 = vmax.f32 %v1581_v6, %v1617_v43  ;;  %v3961_v1 = vpack.i.bf16 %v1692_v3, %v1689_v60  ;;  %v1672_v63 = vsel %vm1334_vm12, %v2581_v30, %v2626_v2 }
 0x5f9   : > { %v1615_v39 = vsel %vm1305_vm13, %v2552_v19, %v2597_v44  ;;  %v1614_v24 = vsel %vm1305_vm13, %v2551_v10, %v2596_v62  ;;  %v2640_v36 = vpop.permute.xlu1 %2639  ;;  %v1673_v6 = vsel %vm1334_vm12, %v2582_v11, %v2627_v54  ;;  %v2632_v19 = vunpack.i.h.bf16 %v2630_v53 }
 0x5fa   : > { %v2605_v4 = vpop.permute.xlu0 %2604  ;;  %2664 = vrot.lane.b32.xlu0 %v3961_v1, %s2770_s13  ;;  %v2631_v10 = vunpack.i.l.bf16 %v2630_v53  ;;  %v1628_v46 = vmax.f32 %v1572_v49, %v1614_v24  ;;  %v1631_v22 = vmax.f32 %v3895_v35, %v1615_v39  ;;  %v1690_v8 = vmax.f32 %v1634_v18, %v1672_v63 }
 0x5fb   : > { %v2607_v3 = vunpack.i.h.bf16 %v2605_v4  ;;  %v2606_v29 = vunpack.i.l.bf16 %v2605_v4  ;;  %v1693_v5 = vmax.f32 %v1637_v55, %v1673_v6  ;;  %v2642_v28 = vunpack.i.h.bf16 %v2640_v36 }
 0x5fc   : > { %v2641_v48 = vunpack.i.l.bf16 %v2640_v36  ;;  %v4172_v63 = vmax.f32 %v3824_v45, 0.0  ;;  %v4174_v4 = vunpack.i.h.bf16 %v3853_v7 }
 0x5fd   : > { %v1671_v42 = vsel %vm1334_vm12, %v2607_v3, %v2632_v19  ;;  %v1675_v50 = vsel %vm1334_vm12, %v2602_v37, %v2607_v3  ;;  %v1670_v11 = vsel %vm1334_vm12, %v2606_v29, %v2631_v10  ;;  %v1674_v30 = vsel %vm1334_vm12, %v2601_v0, %v2606_v29  ;;  %v2650_v58 = vpop.permute.xlu1 %2649 }
 0x5fe   : > { %v1683_v35 = vmax.f32 %v1627_v40, %v1674_v30  ;;  %v1684_v61 = vmax.f32 %v1628_v46, %v1670_v11  ;;  %v1686_v59 = vmax.f32 %v1630_v56, %v1675_v50  ;;  %v1687_v16 = vmax.f32 %v1631_v22, %v1671_v42  ;;  %v2635_v12 = vpop.permute.xlu0 %2634  ;;  %v2729_v11 = vld [vmem:[%s4160_s7] sm:$0xff]   ;;  %v1775_v30 = vld [vmem:[%s4161_s8 + $0x10] sm:$0xff] }
 0x5ff   : > { %v2637_v54 = vunpack.i.h.bf16 %v2635_v12  ;;  %v2636_v2 = vunpack.i.l.bf16 %v2635_v12  ;;  %v2673_v38 = vpack.i.bf16 %v1693_v5, %v1690_v8  ;;  %v2651_v53 = vunpack.i.l.bf16 %v2650_v58  ;;  %2149 = vmatprep.mubr.bf16.mxu1 %v2729_v11 }
 0x600   : > { %v2668_v51 = vpack.i.bf16 %v1686_v59, %v1683_v35  ;;  %v2652_v43 = vunpack.i.h.bf16 %v2650_v58  ;;  %v2678_v49 = vpack.i.bf16 %v1687_v16, %v1684_v61  ;;  %v1624_v21 = vsel %vm1305_vm13, %v2641_v48, %v2611_v41  ;;  %v1776_v58 = vld [vmem:[%s4161_s8 + $0x18] sm:$0xff]  ;;  %v1773_v35 = vld [vmem:[%s4161_s8] sm:$0xff]  ;;  %v1774_v61 = vld [vmem:[%s4161_s8 + $0x8] sm:$0xff] }
 0x601   : > { %v1568_v60 = vsel %vm1276_vm14, %v2636_v2, %v2586_v13  ;;  %v1569_v15 = vsel %vm1276_vm14, %v2637_v54, %v2587_v33  ;;  %2674 = vrot.lane.b32.xlu1 %v2673_v38, %s2770_s13  ;;  %v1625_v20 = vsel %vm1305_vm13, %v2642_v28, %v2612_v52  ;;  %v1680_v55 = vsel %vm1334_vm12, %v2651_v53, %v2621_v47  ;;  %v1924_v59 = vld [vmem:[%s4163_s10] sm:$0xff]  ;;  %v1925_v16 = vld [vmem:[%s4163_s10 + $0x8] sm:$0x3] }
 0x602   : > { %v1576_v44 = vmax.f32 %v1518_v34, %v1568_v60  ;;  %v1579_v62 = vmax.f32 %v1522_v27, %v1569_v15  ;;  %2669 = vrot.lane.b32.xlu0 %v2668_v51, %s2770_s13  ;;  %v2645_v18 = vpop.permute.xlu0 %2644  ;;  %v2660_v34 = vpop.permute.xlu1 %2659  ;;  %v4171_v52 = vunpack.i.h.bf16 %v3881_v57  ;;  %v4173_v57 = vmax.f32 %v3832_v31, 0.0 }
 0x603   : > { %v2647_v33 = vunpack.i.h.bf16 %v2645_v18  ;;  %v2646_v9 = vunpack.i.l.bf16 %v2645_v18  ;;  %v2662_v24 = vunpack.i.h.bf16 %v2660_v34  ;;  %v2661_v40 = vunpack.i.l.bf16 %v2660_v34 }
 0x604   : > { %v1632_v27 = vmax.f32 %v1576_v44, %v1624_v21  ;;  %v1635_v13 = vmax.f32 %v1579_v62, %v1625_v20  ;;  %v1681_v39 = vsel %vm1334_vm12, %v2652_v43, %v4171_v52  ;;  %v4175_v10 = vunpack.i.l.bf16 %v3853_v7 }
 0x605   : > { %v1567_v41 = vsel %vm1276_vm14, %v2647_v33, %v2557_v32  ;;  %v1566_v26 = vsel %vm1276_vm14, %v2646_v9, %v2556_v25  ;;  %2679 = vrot.lane.b32.xlu1 %v2678_v49, %s2770_s13  ;;  %v1679_v45 = vsel %vm1334_vm12, %v2662_v24, %v2602_v37  ;;  %v1678_v31 = vsel %vm1334_vm12, %v2661_v40, %v2601_v0  ;;  %v1779_v37 = vld [vmem:[%s4161_s8 + $0x30] sm:$0xff]  ;;  %v1777_v0 = vld [vmem:[%s4161_s8 + $0x20] sm:$0xff] }
 0x606   : > { %2684 = vrot.lane.b32.xlu0 %v3961_v1, %s2771_s15  ;;  %v2655_v47 = vpop.permute.xlu0 %2654  ;;  %v1688_v36 = vmax.f32 %v1632_v27, %v1680_v55  ;;  %v1691_v17 = vmax.f32 %v1635_v13, %v1681_v39  ;;  %v1573_v25 = vmax.f32 %v4172_v63, %v1567_v41  ;;  %v1570_v6 = vmax.f32 %v4173_v57, %v1566_v26 }
 0x607   : > { %v2657_v32 = vunpack.i.h.bf16 %v2655_v47  ;;  %v2656_v56 = vunpack.i.l.bf16 %v2655_v47 }
 0x608   : > { %v4046_v22 = vpack.c.bf16 %v1691_v17, %v1688_v36  ;;  %v2703_v5 = vpack.i.bf16 %v1691_v17, %v1688_v36 }
 0x609   : > { %v1623_v19 = vsel %vm1305_vm13, %v2657_v32, %v4174_v4  ;;  %v1622_v3 = vsel %vm1305_vm13, %v2656_v56, %v4175_v10  ;;  %2694 = vrot.lane.b32.xlu1 %v2673_v38, %s2771_s15 }
 0x60a   : > { %v1626_v29 = vmax.f32 %v1570_v6, %v1622_v3  ;;  %v1629_v46 = vmax.f32 %v1573_v25, %v1623_v19  ;;  %2689 = vrot.lane.b32.xlu0 %v2668_v51, %s2771_s15 }
 0x60c   : > { %v1682_v7 = vmax.f32 %v1626_v29, %v1678_v31  ;;  %v1685_v8 = vmax.f32 %v1629_v46, %v1679_v45 }
 0x60d   : > { %2699 = vrot.lane.b32.xlu1 %v2678_v49, %s2771_s15 }
 0x60e   : > { %2704 = vrot.lane.b32.xlu0 %v2703_v5, %s2772_s23  ;;  %v4056_v42 = vpack.c.bf16 %v1685_v8, %v1682_v7  ;;  %v2708_v50 = vpack.i.bf16 %v1685_v8, %v1682_v7 }
 0x611   : > { %2714 = vrot.lane.b32.xlu1 %v3961_v1, %s2772_s23  ;;  %v1778_v1 = vld [vmem:[%s4161_s8 + $0x28] sm:$0xff] }
 0x612   : > { %2709 = vrot.lane.b32.xlu0 %v2708_v50, %s2772_s23 }
 0x615   : > { %2719 = vrot.lane.b32.xlu1 %v2668_v51, %s2772_s23 }
 0x616   : > { %1813 = vperm.xlu0 %2291, %v1779_v37  }
 0x619   : > { %1818 = vperm.xlu1 %2377, %v1780_v23  }
 0x61a   : > { %1803 = vperm.xlu0 %2291, %v1777_v0  }
 0x61d   : > { %1808 = vperm.xlu1 %2377, %v1778_v1   ;;  %v2730_v1 = vld [vmem:[%s4160_s7 + $0x8] sm:$0xff]  }
 0x61e   : > { %1793 = vperm.xlu0 %2291, %v1775_v30   ;;  %v2732_v30 = vld [vmem:[%s4160_s7 + $0x18] sm:$0xff]  }
 0x621   : > { %1798 = vperm.xlu1 %2377, %v1776_v58  }
 0x622   : > { %1783 = vperm.xlu0 %2291, %v1773_v35  }
 0x625   : > { %1788 = vperm.xlu1 %2377, %v1774_v61  }
 0x626   : > { %1928 = vperm.xlu0 %2291, %v1924_v59  }
 0x629   : > { %1933 = vperm.xlu1 %2377, %v1925_v16  }
 0x66c   : > { %v2665_v12 = vpop.permute.xlu0 %2664 }
 0x66d   : > { %v2667_v54 = vunpack.i.h.bf16 %v2665_v12  ;;  %v2666_v2 = vunpack.i.l.bf16 %v2665_v12 }
 0x673   : > { %v2675_v28 = vpop.permute.xlu1 %2674 }
 0x674   : > { %v2670_v48 = vpop.permute.xlu0 %2669  ;;  %v2677_v38 = vunpack.i.h.bf16 %v2675_v28  ;;  %v2676_v51 = vunpack.i.l.bf16 %v2675_v28 }
 0x675   : > { %v2672_v53 = vunpack.i.h.bf16 %v2670_v48  ;;  %v2671_v60 = vunpack.i.l.bf16 %v2670_v48 }
 0x676   : > { %v1755_v15 = vsel %vm1752_vm0, %v2666_v2, %v2676_v51  ;;  %v1756_v43 = vsel %vm1752_vm0, %v2667_v54, %v2677_v38 }
 0x677   : > { %v2680_v44 = vpop.permute.xlu1 %2679  ;;  %v1764_v62 = vpack.c.bf16 %v1756_v43, %v1755_v15 }
 0x678   : > { %v2685_v49 = vpop.permute.xlu0 %2684  ;;  %v2682_v18 = vunpack.i.h.bf16 %v2680_v44  ;;  %v2681_v21 = vunpack.i.l.bf16 %v2680_v44 }
 0x679   : > { %2133 = vmatprep.subr.bf16.mxu1 %v1764_v62  ;;  %v2687_v20 = vunpack.i.h.bf16 %v2685_v49  ;;  %v2686_v34 = vunpack.i.l.bf16 %v2685_v49 }
 0x67a   : > { %2134 = vmatpush3.bf16.msra.mxu1 %v1764_v62  ;;  %v1753_v33 = vsel %vm1752_vm0, %v2671_v60, %v2681_v21  ;;  %v1754_v9 = vsel %vm1752_vm0, %v2672_v53, %v2682_v18 }
 0x67b   : > { %v2695_v27 = vpop.permute.xlu1 %2694  ;;  %v1763_v13 = vpack.c.bf16 %v1754_v9, %v1753_v33 }
 0x67c   : > { %v2690_v55 = vpop.permute.xlu0 %2689  ;;  %v2697_v41 = vunpack.i.h.bf16 %v2695_v27  ;;  %v2696_v26 = vunpack.i.l.bf16 %v2695_v27 }
 0x67d   : > { %2135 = vmatprep.subr.bf16.mxu1 %v1763_v13  ;;  %v2692_v52 = vunpack.i.h.bf16 %v2690_v55  ;;  %v2691_v39 = vunpack.i.l.bf16 %v2690_v55 }
 0x67e   : > { %2136 = vmatpush3.bf16.msra.mxu1 %v1763_v13  ;;  %v1734_v24 = vsel %vm1731_vm1, %v2686_v34, %v2696_v26  ;;  %v1735_v47 = vsel %vm1731_vm1, %v2687_v20, %v2697_v41 }
 0x67f   : > { %v2700_v36 = vpop.permute.xlu1 %2699  ;;  %v1762_v40 = vpack.c.bf16 %v1735_v47, %v1734_v24 }
 0x680   : > { %v2705_v32 = vpop.permute.xlu0 %2704  ;;  %v2702_v56 = vunpack.i.h.bf16 %v2700_v36  ;;  %v2701_v17 = vunpack.i.l.bf16 %v2700_v36 }
 0x681   : > { %2137 = vmatprep.subr.bf16.mxu1 %v1762_v40  ;;  %v2707_v63 = vunpack.i.h.bf16 %v2705_v32  ;;  %v2706_v25 = vunpack.i.l.bf16 %v2705_v32 }
 0x682   : > { %2138 = vmatpush3.bf16.msra.mxu1 %v1762_v40  ;;  %v1732_v57 = vsel %vm1731_vm1, %v2691_v39, %v2701_v17  ;;  %v1733_v6 = vsel %vm1731_vm1, %v2692_v52, %v2702_v56  ;;  %v2733_v40 = vld [vmem:[%s4162_s9] sm:$0x1f]  }
 0x683   : > { %v2715_v4 = vpop.permute.xlu1 %2714  ;;  %v1761_v19 = vpack.c.bf16 %v1733_v6, %v1732_v57 }
 0x684   : > { %v2710_v10 = vpop.permute.xlu0 %2709  ;;  %v2717_v3 = vunpack.i.h.bf16 %v2715_v4  ;;  %v2716_v29 = vunpack.i.l.bf16 %v2715_v4 }
 0x685   : > { %2139 = vmatprep.subr.bf16.mxu1 %v1761_v19  ;;  %v2712_v46 = vunpack.i.h.bf16 %v2710_v10  ;;  %v2711_v45 = vunpack.i.l.bf16 %v2710_v10 }
 0x686   : > { %2140 = vmatpush3.bf16.msra.mxu1 %v1761_v19  ;;  %v1713_v31 = vsel %vm1710_vm2, %v2706_v25, %v2716_v29  ;;  %v1714_v7 = vsel %vm1710_vm2, %v2707_v63, %v2717_v3 }
 0x687   : > { %v2720_v8 = vpop.permute.xlu1 %2719  ;;  %v1760_v5 = vpack.c.bf16 %v1714_v7, %v1713_v31 }
 0x688   : > { %v2722_v50 = vunpack.i.h.bf16 %v2720_v8  ;;  %v2721_v37 = vunpack.i.l.bf16 %v2720_v8 }
 0x689   : > { %2141 = vmatprep.subr.bf16.mxu1 %v1760_v5 }
 0x68a   : > { %2142 = vmatpush3.bf16.msra.mxu1 %v1760_v5  ;;  %v1711_v23 = vsel %vm1710_vm2, %v2711_v45, %v2721_v37  ;;  %v1712_v0 = vsel %vm1710_vm2, %v2712_v46, %v2722_v50 }
 0x68b   : > { %v1759_v11 = vpack.c.bf16 %v1712_v0, %v1711_v23 }
 0x68d   : > { %2143 = vmatprep.subr.bf16.mxu1 %v1759_v11 }
 0x68e   : > { %2144 = vmatpush3.bf16.msra.mxu1 %v1759_v11 }
 0x68f   : > { %2145 = vmatprep.subr.bf16.mxu1 %v4046_v22 }
 0x691   : > { %v1814_v59 = vpop.permute.xlu0 %1813 }
 0x692   : > { %2146 = vmatpush3.bf16.msra.mxu1 %v4046_v22  ;;  %v2773_v22 = vmov 0.0  }
 0x693   : > { %2147 = vmatprep.subr.bf16.mxu1 %v4056_v42  ;;  %2157 = vmatprep.subr.bf16.mxu0 %v2773_v22 }
 0x694   : > { %2165 = vmatprep.mubr.msk.bf16.mxu0 %vm2774_vm3, %v2773_v22  ;;  %v1819_v35 = vpop.permute.xlu1 %1818 }
 0x695   : > { %v1804_v48 = vpop.permute.xlu0 %1803 }
 0x696   : > { %2148 = vmatpush3.bf16.msra.mxu1 %v4056_v42 }
 0x698   : > { %v1809_v12 = vpop.permute.xlu1 %1808 }
 0x699   : > { %2150 = vmatmul.mubr.bf16.vlgmr.msra.gmra.mxu1 %v2730_v1  ;;  %v1794_v49 = vpop.permute.xlu0 %1793 }
 0x69a   : > { %2153 = vmatprep.mubr.bf16.mxu1 %v2731_v14 }
 0x69c   : > { %v1799_v53 = vpop.permute.xlu1 %1798 }
 0x69d   : > { %v1784_v41 = vpop.permute.xlu0 %1783 }
 0x6a0   : > { %v1789_v9 = vpop.permute.xlu1 %1788 }
 0x6a1   : > { %2154 = vmatmul.mubr.bf16.gmra.mxu1 %v2732_v30  ;;  %v1929_v32 = vpop.permute.xlu0 %1928 }
 0x6a4   : > { %v1934_v25 = vpop.permute.xlu1 %1933 }
 0x759   : > { %v2151_v58 = vpop.f32.mrf.mxu1 }
 0x75a   : > { %v1888_v34 = vadd.f32 %v2151_v58, %v1794_v49 }
 0x75b   : > { %v1879_v61 = vpop.f32.mrf.mxu1 }
 0x75c   : > { %v1912_v26 = vmax.f32 %v1888_v34, 0.0  ;;  %v1880_v52 = vadd.f32 %v1879_v61, %v1784_v41 }
 0x75d   : > { %v2152_v42 = vpop.f32.mrf.mxu1 }
 0x75e   : > { %v1891_v18 = vadd.f32 %v2152_v42, %v1799_v53  ;;  %v1910_v47 = vmax.f32 %v1880_v52, 0.0 }
 0x75f   : > { %v1882_v16 = vpop.f32.mrf.mxu1 }
 0x760   : > { %v1913_v27 = vmax.f32 %v1891_v18, 0.0  ;;  %v1883_v13 = vadd.f32 %v1882_v16, %v1789_v9 }
 0x761   : > { %v2155_v28 = vpop.f32.mrf.mxu1 }
 0x762   : > { %v1904_v2 = vadd.f32 %v2155_v28, %v1814_v59  ;;  %v1921_v39 = vpack.c.bf16 %v1913_v27, %v1912_v26  ;;  %v1911_v24 = vmax.f32 %v1883_v13, 0.0 }
 0x763   : > { %v1895_v54 = vpop.f32.mrf.mxu1 }
 0x764   : > { %v1916_v15 = vmax.f32 %v1904_v2, 0.0  ;;  %v1896_v43 = vadd.f32 %v1895_v54, %v1804_v48  ;;  %v1920_v36 = vpack.c.bf16 %v1911_v24, %v1910_v47 }
 0x765   : > { %v2156_v38 = vpop.f32.mrf.mxu1 }
 0x766   : > { %v1907_v51 = vadd.f32 %v2156_v38, %v1819_v35  ;;  %v1914_v33 = vmax.f32 %v1896_v43, 0.0 }
 0x767   : > { %v1898_v60 = vpop.f32.mrf.mxu1 }
 0x768   : > { %v1917_v44 = vmax.f32 %v1907_v51, 0.0  ;;  %v1899_v62 = vadd.f32 %v1898_v60, %v1809_v12 }
 0x76a   : > { %v1923_v21 = vpack.c.bf16 %v1917_v44, %v1916_v15  ;;  %v1915_v20 = vmax.f32 %v1899_v62, 0.0 }
 0x76c   : > { %2158 = vmatpush3.bf16.msra.mxu0 %v1923_v21  ;;  %v1922_v55 = vpack.c.bf16 %v1915_v20, %v1914_v33 }
 0x76d   : > { %2159 = vmatprep.subr.bf16.mxu0 %v2773_v22 }
 0x770   : > { %2160 = vmatpush3.bf16.msra.mxu0 %v1922_v55 }
 0x771   : > { %2161 = vmatprep.subr.bf16.mxu0 %v2773_v22 }
 0x774   : > { %2162 = vmatpush3.bf16.msra.mxu0 %v1921_v39 }
 0x775   : > { %2163 = vmatprep.subr.bf16.mxu0 %v2773_v22 }
 0x778   : > { %2164 = vmatpush3.bf16.msra.mxu0 %v1920_v36 }
 0x77b   : > { %2166 = vmatmul.mubr.msk.bf16.vlgmr.msra.gmra.mxu0 %vm1397_vm15, %v2733_v40 }
 0x83b   : > { %v1978_v56 = vpop.f32.mrf.mxu0 }
 0x83c   : > { %v1979_v17 = vadd.f32 %v1978_v56, %v1929_v32 }
 0x83d   : > { %v2167_v63 = vpop.f32.mrf.mxu0 }
 0x83e   : > { %1985 = vst [vmem:[%s375_s19] sm:$0xff] %v1979_v17  ;;  %1993 = sbr.rel (!%p2860_p4) target bundleno = 2123 (0x84b), region = 68 }
 0x83f   : > { %v1981_v57 = vpop.f32.mrf.mxu0 }
 0x840   : > { %v1982_v6 = vadd.f32 %v1981_v57, %v1934_v25 }
 0x841   : > { %v2168_v4 = vpop.f32.mrf.mxu0 }
 0x842   : > { %1986 = vst [vmem:[%s375_s19 + $0x8] sm:$0x3] %v1982_v6 }
 0x845   : > { %v2026_v19 = vld [vmem:[%s375_s19] sm:$0xff] }
 0x846   : > { %2027 = vst [vmem:[%s1995_s27] sm:$0xff] %v2026_v19 }
 0x849   : > { %v2028_v10 = vld [vmem:[%s375_s19 + $0x8] sm:$0xff] }
 0x84a   : > { %2029 = vst [vmem:[%s1995_s27 + $0x10] sm:$0xff] %v2028_v10 }
 0x84b PF: > { %p18_p8 = scmp.ge.s32.totalorder %s2850_s21, 4   ;;  %s4176_s17 = smov %s2752_s18 }
 0x84c   : > { %s4177_s18 = smov %s2858_s24  ;;  %s4178_s19 = smov %s2850_s21 }
 0x84d   :  { %20 = sbr.rel (!%p18_p8) target bundleno = 2 (0x2), region = 132 }

</bundles_post_ra>
